<compile_context>
chip_gen: v5e
topology: v5e:2x2
jax: 0.10.0
libtpu: 0.0.40
codegen_flags: <defaults>
</compile_context>

<pallas_src>
import numpy as np
import jax
import jax.numpy as jnp
from jax import lax
from jax.experimental import pallas as pl
from jax.experimental.pallas import tpu as pltpu

# ---------------- synthetic config (small, consistent with the module) --------
BATCH = 2
SEQ = 8
HIDDEN = 32
NUM_HEADS = 4
HEAD_DIM = HIDDEN // NUM_HEADS
HALF = HEAD_DIM // 2
INTERMEDIATE = 64
NUM_LAYERS = 2          # config.num_hidden_layers_decoder
ROPE_THETA = 10000.0
EPS = 1e-5


# ---------------- fused decoder kernel ----------------------------------------
def _make_decoder_kernel(seq, hidden, num_heads, head_dim, inter, eps):
    S, H, nH, hd, I = seq, hidden, num_heads, head_dim, inter
    half = hd // 2
    W = nH * half               # width of one rotary-half slab (= H // 2)
    scale = hd ** -0.5

    def kernel(x_ref, cos_ref, sin_ref,
               ln1_ref, wqkv_ref, wo_ref,
               ln2_ref, wgu_ref, wd_ref,
               lnf_ref, o_ref, resid_ref):
        l = pl.program_id(1)                     # layer axis ("arbitrary", innermost)

        @pl.when(l == 0)
        def _():                                 # new batch block: load residual stream
            resid_ref[...] = x_ref[0]

        x = resid_ref[...]                       # (S, H) f32 residual stream
        cos = cos_ref[...]                       # (S, W) f32, pre-tiled head-major slab layout
        sin = sin_ref[...]

        # plain causal additive bias per sequence block, built in-kernel (no mask DMA)
        r = lax.broadcasted_iota(jnp.int32, (S, S), 0)
        c = lax.broadcasted_iota(jnp.int32, (S, S), 1)
        bias = jnp.where(c <= r, 0.0, -1e30).astype(jnp.float32)

        def rmsnorm(v, w):
            var = jnp.mean(v * v, axis=-1, keepdims=True)
            return v * lax.rsqrt(var + eps) * w

        # ---------------- self-attention ----------------
        xn = rmsnorm(x, ln1_ref[0])
        qkv = jnp.dot(xn.astype(jnp.bfloat16), wqkv_ref[0],
                      preferred_element_type=jnp.float32)          # (S, 3H) cols [Q1|Q2|K1|K2|V]

        q1 = qkv[:, 0 * W:1 * W]
        q2 = qkv[:, 1 * W:2 * W]
        k1 = qkv[:, 2 * W:3 * W]
        k2 = qkv[:, 3 * W:4 * W]
        vv = qkv[:, 4 * W:]                                        # (S, H) head-major V

        # RoPE, complex-rotation form (== q*cos + rotate_half(q)*sin), pure VPU elementwise,
        # done in the 2-D slab layout so no per-head slicing / broadcasting is needed.
        q1r = q1 * cos - q2 * sin
        q2r = q2 * cos + q1 * sin
        k1r = k1 * cos - k2 * sin
        k2r = k2 * cos + k1 * sin

        # one relayout per slab: slab (S, nH*w) -> head-batched (nH, S, w); rotary halves are
        # concatenated along d so QK^T is a SINGLE contraction with d = head_dim.
        qh = jnp.concatenate([q1r.reshape(S, nH, half), q2r.reshape(S, nH, half)], axis=-1)
        kh = jnp.concatenate([k1r.reshape(S, nH, half), k2r.reshape(S, nH, half)], axis=-1)
        qh = jnp.transpose(qh, (1, 0, 2))                          # (nH, S, hd)
        kh = jnp.transpose(kh, (1, 0, 2))
        vh = jnp.transpose(vv.reshape(S, nH, hd), (1, 0, 2))       # (nH, S, hd)

        s = jnp.einsum('ntd,nud->ntu',
                       qh.astype(jnp.bfloat16), kh.astype(jnp.bfloat16),
                       preferred_element_type=jnp.float32)         # (nH, S, S) f32
        s = s * scale + bias
        m = jnp.max(s, axis=-1, keepdims=True)                     # softmax in f32
        p = jnp.exp(s - m)
        p = p * pl.reciprocal(jnp.sum(p, axis=-1, keepdims=True), approx=True)
        ctx = jnp.einsum('ntu,nud->ntd',
                         p.astype(jnp.bfloat16), vh.astype(jnp.bfloat16),
                         preferred_element_type=jnp.float32)       # (nH, S, hd)

        # single output-projection matmul: heads folded back onto the lane axis,
        # head reduction lives inside the MXU contraction.
        ctx2d = jnp.transpose(ctx, (1, 0, 2)).reshape(S, H)
        attn = jnp.dot(ctx2d.astype(jnp.bfloat16), wo_ref[0],
                       preferred_element_type=jnp.float32)
        x = x + attn                                               # residual

        # ---------------- SwiGLU MLP ----------------
        hn = rmsnorm(x, ln2_ref[0])
        gu = jnp.dot(hn.astype(jnp.bfloat16), wgu_ref[0],
                     preferred_element_type=jnp.float32)           # (S, 2I) fused gate|up
        g = gu[:, :I]
        u = gu[:, I:]
        act = g * jax.nn.sigmoid(g) * u                            # silu(g) * u, f32
        x = x + jnp.dot(act.astype(jnp.bfloat16), wd_ref[0],
                        preferred_element_type=jnp.float32)        # residual

        resid_ref[...] = x

        @pl.when(l == pl.num_programs(1) - 1)
        def _():
            o_ref[0] = rmsnorm(x, lnf_ref[...])                    # final RMSNorm

    return kernel


def llama_decoder_pallas(x, layers, final_ln):
    B, S, H = x.shape
    nH, hd, half = NUM_HEADS, HEAD_DIM, HALF
    I = layers[0]["wg"].shape[1]
    L = len(layers)
    W = nH * half

    # ---- host-side one-time packing --------------------------------------------------------
    def rot_halves(w):
        # reorder output columns of a (H, H) q/k weight so the kernel sees contiguous slabs:
        # [all heads' first rotary halves | all heads' second rotary halves], head-major.
        w3 = w.reshape(H, nH, hd)
        return jnp.concatenate([w3[:, :, :half].reshape(H, W),
                                w3[:, :, half:].reshape(H, W)], axis=1)

    wqkv = jnp.stack([jnp.concatenate([rot_halves(p["wq"]), rot_halves(p["wk"]), p["wv"]],
                                      axis=1) for p in layers]).astype(jnp.bfloat16)   # (L,H,3H)
    wo = jnp.stack([p["wo"] for p in layers]).astype(jnp.bfloat16)                     # (L,H,H)
    wgu = jnp.stack([jnp.concatenate([p["wg"], p["wu"]], axis=1)
                     for p in layers]).astype(jnp.bfloat16)                            # (L,H,2I)
    wd = jnp.stack([p["wd"] for p in layers]).astype(jnp.bfloat16)                     # (L,I,H)
    ln1 = jnp.stack([p["ln1"] for p in layers])                                        # (L,1,H) f32
    ln2 = jnp.stack([p["ln2"] for p in layers])                                        # (L,1,H) f32

    # rotary cos/sin (LlamaRotaryEmbedding) per position, pre-tiled across heads into the exact
    # (S, nH*half) slab lane-layout used by the kernel (same frequencies for every head).
    inv_freq = 1.0 / (ROPE_THETA ** (np.arange(0, hd, 2, dtype=np.float32) / hd))
    freqs = np.outer(np.arange(S, dtype=np.float32), inv_freq)                         # (S, half)
    cos = jnp.asarray(np.tile(np.cos(freqs), (1, nH)).astype(np.float32))              # (S, W)
    sin = jnp.asarray(np.tile(np.sin(freqs), (1, nH)).astype(np.float32))

    # ---- VMEM budget & cost estimate (computed, not hard-coded) ----------------------------
    def nbytes(a):
        return int(a.size * a.dtype.itemsize)
    per_layer_weight_bytes = (nbytes(wqkv) + nbytes(wo) + nbytes(wgu) + nbytes(wd)
                              + nbytes(ln1) + nbytes(ln2)) // L
    resident_bytes = (nbytes(x) // B + nbytes(cos) + nbytes(sin) + nbytes(final_ln)
                      + S * H * 4          # residual scratch
                      + 2 * S * H * 4)     # double-buffered output block
    vmem_limit = int(min(48 * 2 ** 20,      # leave headroom on v7x's 64 MiB VMEM
                         max(16 * 2 ** 20,
                             4 * (2 * per_layer_weight_bytes + resident_bytes))))

    flops_per_bl = (2 * S * H * 3 * H          # fused QKV
                    + 2 * 2 * nH * S * S * hd  # QK^T and PV
                    + 2 * S * H * H            # output projection
                    + 2 * S * H * 2 * I        # fused gate|up
                    + 2 * S * I * H)           # down projection
    cost = pl.CostEstimate(
        flops=int(B * L * flops_per_bl),
        transcendentals=int(B * L * (nH * S * S + S * I) + B * S * (2 * L + 1)),
        bytes_accessed=int(2 * nbytes(x) + L * per_layer_weight_bytes
                           + nbytes(cos) + nbytes(sin) + nbytes(final_ln)),
    )

    kernel = _make_decoder_kernel(S, H, nH, hd, I, EPS)
    out = pl.pallas_call(
        kernel,
        out_shape=jax.ShapeDtypeStruct((B, S, H), jnp.float32),
        grid_spec=pltpu.PrefetchScalarGridSpec(
            num_scalar_prefetch=0,
            grid=(B, L),                                             # batch parallel, layer inner
            in_specs=[
                pl.BlockSpec((1, S, H), lambda b, l: (b, 0, 0)),     # x (resident across l)
                pl.BlockSpec((S, W), lambda b, l: (0, 0)),           # cos
                pl.BlockSpec((S, W), lambda b, l: (0, 0)),           # sin
                pl.BlockSpec((1, 1, H), lambda b, l: (l, 0, 0)),     # ln1   (streamed per layer)
                pl.BlockSpec((1, H, 3 * H), lambda b, l: (l, 0, 0)),  # wqkv
                pl.BlockSpec((1, H, H), lambda b, l: (l, 0, 0)),     # wo
                pl.BlockSpec((1, 1, H), lambda b, l: (l, 0, 0)),     # ln2
                pl.BlockSpec((1, H, 2 * I), lambda b, l: (l, 0, 0)),  # wgu
                pl.BlockSpec((1, I, H), lambda b, l: (l, 0, 0)),     # wd
                pl.BlockSpec((1, H), lambda b, l: (0, 0)),           # final layernorm weight
            ],
            out_specs=pl.BlockSpec((1, S, H), lambda b, l: (b, 0, 0)),
            scratch_shapes=[pltpu.VMEM((S, H), jnp.float32)],        # residual-stream carry
        ),
        compiler_params=pltpu.CompilerParams(
            dimension_semantics=("parallel", "arbitrary"),
            vmem_limit_bytes=vmem_limit,
        ),
        cost_estimate=cost,
    )(x, cos, sin, ln1, wqkv, wo, ln2, wgu, wd, final_ln)
    # TODO(synk): for benchmarking at the toy shape, pad H to 128 for lane-dense stores; real
    # Llama hidden sizes are already multiples of 128.
    return out


# ---------------- pure-JAX reference (for correctness check) ------------------
def llama_decoder_ref(x, layers, final_ln):
    B, S, H = x.shape
    hd = HEAD_DIM
    scale = hd ** -0.5
    inv_freq = 1.0 / (ROPE_THETA ** (np.arange(0, hd, 2, dtype=np.float32) / hd))
    freqs = np.outer(np.arange(S, dtype=np.float32), inv_freq)
    emb = np.concatenate([freqs, freqs], axis=-1)
    cos = jnp.asarray(np.cos(emb).astype(np.float32))        # (S, hd)
    sin = jnp.asarray(np.sin(emb).astype(np.float32))
    i_idx = np.arange(S)[:, None]
    j_idx = np.arange(S)[None, :]
    mask = jnp.asarray(np.where(j_idx <= i_idx, 0.0, -np.inf).astype(np.float32))

    def rms(v, w):
        return v * jax.lax.rsqrt(jnp.mean(v * v, -1, keepdims=True) + EPS) * w

    def rotate_half(t):
        t1, t2 = t[..., :hd // 2], t[..., hd // 2:]
        return jnp.concatenate([-t2, t1], axis=-1)

    for p in layers:
        xn = rms(x, p["ln1"])
        q = (xn @ p["wq"]).reshape(B, S, NUM_HEADS, hd).transpose(0, 2, 1, 3)
        k = (xn @ p["wk"]).reshape(B, S, NUM_HEADS, hd).transpose(0, 2, 1, 3)
        v = (xn @ p["wv"]).reshape(B, S, NUM_HEADS, hd).transpose(0, 2, 1, 3)
        q = q * cos[None, None] + rotate_half(q) * sin[None, None]
        k = k * cos[None, None] + rotate_half(k) * sin[None, None]
        s = jnp.einsum("bhqd,bhkd->bhqk", q, k) * scale + mask[None, None]
        pw = jax.nn.softmax(s.astype(jnp.float32), axis=-1)
        o = jnp.einsum("bhqk,bhkd->bhqd", pw, v).transpose(0, 2, 1, 3).reshape(B, S, H)
        x = x + o @ p["wo"]
        hn = rms(x, p["ln2"])
        x = x + (jax.nn.silu(hn @ p["wg"]) * (hn @ p["wu"])) @ p["wd"]
    return rms(x, final_ln)


# ---------------- deterministic parameter construction ------------------------
def init_params(key):
    layers = []
    for l in range(NUM_LAYERS):
        ks = jax.random.split(jax.random.fold_in(key, l), 7)
        w = lambda k, shape: jax.random.normal(k, shape, jnp.float32) * 0.05
        layers.append(dict(
            ln1=jnp.ones((1, HIDDEN), jnp.float32),
            wq=w(ks[0], (HIDDEN, HIDDEN)),
            wk=w(ks[1], (HIDDEN, HIDDEN)),
            wv=w(ks[2], (HIDDEN, HIDDEN)),
            wo=w(ks[3], (HIDDEN, HIDDEN)),
            ln2=jnp.ones((1, HIDDEN), jnp.float32),
            wg=w(ks[4], (HIDDEN, INTERMEDIATE)),
            wu=w(ks[5], (HIDDEN, INTERMEDIATE)),
            wd=w(ks[6], (INTERMEDIATE, HIDDEN)),
        ))
    final_ln = jnp.ones((1, HIDDEN), jnp.float32)
    return layers, final_ln


# ---------------- main ---------------------------------------------------------
if __name__ == "__main__":
    key = jax.random.PRNGKey(0)
    x = jax.random.normal(jax.random.fold_in(key, 123), (BATCH, SEQ, HIDDEN), jnp.float32)
    layers, final_ln = init_params(key)

    out = llama_decoder_pallas(x, layers, final_ln)
    out = jax.block_until_ready(out)

    ref = llama_decoder_ref(x, layers, final_ln)           # pure f32 reference
    assert out.shape == (BATCH, SEQ, HIDDEN)
    err = float(jnp.max(jnp.abs(out - ref)))
    # tolerance 2e-2: kernel feeds bf16 operands to the MXU (f32 accumulation / statistics),
    # the reference is full f32; observed error is a few 1e-3.
    assert np.isfinite(err) and err < 2e-2, f"kernel/reference mismatch: {err}"
    print("KERNEL_OK")
</pallas_src>

<mosaic_0001>
module attributes {stable_mosaic.version = 11 : i64} {
  func.func @kernel(%arg0: i32, %arg1: i32, %arg2: memref<1x8x32xf32, #tpu.memory_space<vmem>>, %arg3: memref<8x16xf32, #tpu.memory_space<vmem>>, %arg4: memref<8x16xf32, #tpu.memory_space<vmem>>, %arg5: memref<1x1x32xf32, #tpu.memory_space<vmem>>, %arg6: memref<1x32x96xbf16, #tpu.memory_space<vmem>>, %arg7: memref<1x32x32xbf16, #tpu.memory_space<vmem>>, %arg8: memref<1x1x32xf32, #tpu.memory_space<vmem>>, %arg9: memref<1x32x128xbf16, #tpu.memory_space<vmem>>, %arg10: memref<1x64x32xbf16, #tpu.memory_space<vmem>>, %arg11: memref<1x32xf32, #tpu.memory_space<vmem>>, %arg12: memref<1x8x32xf32, #tpu.memory_space<vmem>>, %arg13: memref<8x32xf32, #tpu.memory_space<vmem>>) attributes {dimension_semantics = [#tpu.dimension_semantics<parallel>, #tpu.dimension_semantics<arbitrary>], iteration_bounds = array<i64: 2, 2>, scalar_prefetch = 0 : i64, scratch_operands = 1 : i64, tpu.core_type = #tpu.core_type<tc>, window_params = [{transform_indices = @transform_0, window_bounds = array<i64: 1, 8, 32>}, {pipeline_mode = #tpu.pipeline_mode<synchronous>, transform_indices = @transform_1, window_bounds = array<i64: 8, 16>}, {pipeline_mode = #tpu.pipeline_mode<synchronous>, transform_indices = @transform_2, window_bounds = array<i64: 8, 16>}, {transform_indices = @transform_3, window_bounds = array<i64: 1, 1, 32>}, {transform_indices = @transform_4, window_bounds = array<i64: 1, 32, 96>}, {transform_indices = @transform_5, window_bounds = array<i64: 1, 32, 32>}, {transform_indices = @transform_6, window_bounds = array<i64: 1, 1, 32>}, {transform_indices = @transform_7, window_bounds = array<i64: 1, 32, 128>}, {transform_indices = @transform_8, window_bounds = array<i64: 1, 64, 32>}, {pipeline_mode = #tpu.pipeline_mode<synchronous>, transform_indices = @transform_9, window_bounds = array<i64: 1, 32>}, {transform_indices = @transform_10, window_bounds = array<i64: 1, 8, 32>}]} {
    %c0_i32 = arith.constant 0 : i32
    %0 = arith.cmpi eq, %arg1, %c0_i32 : i32
    %1 = arith.extui %0 : i1 to i32
    %c0_i32_0 = arith.constant 0 : i32
    %2 = arith.cmpi ne, %1, %c0_i32_0 : i32
    scf.if %2 {
      %c0_44 = arith.constant 0 : index
      %c0_45 = arith.constant 0 : index
      %c0_46 = arith.constant 0 : index
      %121 = vector.load %arg2[%c0_44, %c0_45, %c0_46] : memref<1x8x32xf32, #tpu.memory_space<vmem>>, vector<1x8x32xf32>
      %122 = vector.shape_cast %121 : vector<1x8x32xf32> to vector<8x32xf32>
      %c0_47 = arith.constant 0 : index
      %c0_48 = arith.constant 0 : index
      %123 = vector.load %arg13[%c0_47, %c0_48] : memref<8x32xf32, #tpu.memory_space<vmem>>, vector<8x32xf32>
      tpu.vector_store %arg13[%c0_47, %c0_48], %122 {strides = array<i32>} : memref<8x32xf32, #tpu.memory_space<vmem>>, vector<8x32xf32>,
    } else {
    }
    %c0 = arith.constant 0 : index
    %c0_1 = arith.constant 0 : index
    %3 = vector.load %arg13[%c0, %c0_1] : memref<8x32xf32, #tpu.memory_space<vmem>>, vector<8x32xf32>
    %c0_2 = arith.constant 0 : index
    %c0_3 = arith.constant 0 : index
    %4 = vector.load %arg3[%c0_2, %c0_3] : memref<8x16xf32, #tpu.memory_space<vmem>>, vector<8x16xf32>
    %c0_4 = arith.constant 0 : index
    %c0_5 = arith.constant 0 : index
    %5 = vector.load %arg4[%c0_4, %c0_5] : memref<8x16xf32, #tpu.memory_space<vmem>>, vector<8x16xf32>
    %6 = tpu.iota {dimensions = array<i32: 0>} : vector<8x8xi32>
    %7 = tpu.iota {dimensions = array<i32: 1>} : vector<8x8xi32>
    %8 = arith.cmpi sle, %7, %6 : vector<8x8xi32>
    %cst = arith.constant 0.000000e+00 : f32
    %cst_6 = arith.constant -1.000000e+30 : f32
    %9 = vector.broadcast %cst : f32 to vector<8x8xf32>
    %10 = vector.broadcast %cst_6 : f32 to vector<8x8xf32>
    %11 = arith.select %8, %9, %10 : vector<8x8xi1>, vector<8x8xf32>
    %c0_7 = arith.constant 0 : index
    %c0_8 = arith.constant 0 : index
    %c0_9 = arith.constant 0 : index
    %12 = vector.load %arg5[%c0_7, %c0_8, %c0_9] : memref<1x1x32xf32, #tpu.memory_space<vmem>>, vector<1x1x32xf32>
    %13 = vector.shape_cast %12 : vector<1x1x32xf32> to vector<1x32xf32>
    %14 = arith.mulf %3, %3 : vector<8x32xf32>
    %cst_10 = arith.constant dense<0.000000e+00> : vector<8xf32>
    %15 = vector.multi_reduction <add>, %14, %cst_10 [1] : vector<8x32xf32> to vector<8xf32>
    %16 = vector.shape_cast %15 : vector<8xf32> to vector<8x1xf32>
    %cst_11 = arith.constant 3.200000e+01 : f32
    %17 = vector.broadcast %cst_11 : f32 to vector<8x1xf32>
    %18 = arith.divf %16, %17 : vector<8x1xf32>
    %cst_12 = arith.constant 9.99999974E-6 : f32
    %19 = vector.broadcast %cst_12 : f32 to vector<8x1xf32>
    %20 = arith.addf %18, %19 : vector<8x1xf32>
    %21 = math.rsqrt %20 : vector<8x1xf32>
    %22 = vector.broadcast %21 : vector<8x1xf32> to vector<8x32xf32>
    %23 = arith.mulf %3, %22 : vector<8x32xf32>
    %24 = vector.broadcast %13 : vector<1x32xf32> to vector<8x32xf32>
    %25 = arith.mulf %23, %24 : vector<8x32xf32>
    %26 = arith.truncf %25 : vector<8x32xf32> to vector<8x32xbf16>
    %c0_13 = arith.constant 0 : index
    %c0_14 = arith.constant 0 : index
    %c0_15 = arith.constant 0 : index
    %27 = vector.load %arg6[%c0_13, %c0_14, %c0_15] : memref<1x32x96xbf16, #tpu.memory_space<vmem>>, vector<1x32x96xbf16>
    %28 = vector.shape_cast %27 : vector<1x32x96xbf16> to vector<32x96xbf16>
    %cst_16 = arith.constant dense<0.000000e+00> : vector<8x96xf32>
    %29 = tpu.matmul %26, %28, %cst_16 {dimension_numbers = #tpu.dot_dimension_numbers<[1], [0], [0], [1], [0, 0, 1, 1], [], []>} : vector<8x32xbf16>, vector<32x96xbf16>, vector<8x96xf32> -> vector<8x96xf32>
    %30 = vector.extract_strided_slice %29 {offsets = [0, 0], sizes = [8, 16], strides = [1, 1]} : vector<8x96xf32> to vector<8x16xf32>
    %31 = vector.extract_strided_slice %29 {offsets = [0, 16], sizes = [8, 16], strides = [1, 1]} : vector<8x96xf32> to vector<8x16xf32>
    %32 = vector.extract_strided_slice %29 {offsets = [0, 32], sizes = [8, 16], strides = [1, 1]} : vector<8x96xf32> to vector<8x16xf32>
    %33 = vector.extract_strided_slice %29 {offsets = [0, 48], sizes = [8, 16], strides = [1, 1]} : vector<8x96xf32> to vector<8x16xf32>
    %34 = vector.extract_strided_slice %29 {offsets = [0, 64], sizes = [8, 32], strides = [1, 1]} : vector<8x96xf32> to vector<8x32xf32>
    %35 = arith.mulf %30, %4 : vector<8x16xf32>
    %36 = arith.mulf %31, %5 : vector<8x16xf32>
    %37 = arith.subf %35, %36 : vector<8x16xf32>
    %38 = arith.mulf %31, %4 : vector<8x16xf32>
    %39 = arith.mulf %30, %5 : vector<8x16xf32>
    %40 = arith.addf %38, %39 : vector<8x16xf32>
    %41 = arith.mulf %32, %4 : vector<8x16xf32>
    %42 = arith.mulf %33, %5 : vector<8x16xf32>
    %43 = arith.subf %41, %42 : vector<8x16xf32>
    %44 = arith.mulf %33, %4 : vector<8x16xf32>
    %45 = arith.mulf %32, %5 : vector<8x16xf32>
    %46 = arith.addf %44, %45 : vector<8x16xf32>
    %47 = vector.shape_cast %37 : vector<8x16xf32> to vector<8x4x4xf32>
    %48 = vector.shape_cast %40 : vector<8x16xf32> to vector<8x4x4xf32>
    %49 = tpu.concatenate %47, %48 in 2 : vector<8x4x4xf32>, vector<8x4x4xf32> -> vector<8x4x8xf32>
    %50 = vector.shape_cast %43 : vector<8x16xf32> to vector<8x4x4xf32>
    %51 = vector.shape_cast %46 : vector<8x16xf32> to vector<8x4x4xf32>
    %52 = tpu.concatenate %50, %51 in 2 : vector<8x4x4xf32>, vector<8x4x4xf32> -> vector<8x4x8xf32>
    %53 = tpu.transpose %49, [1, 0, 2] : vector<8x4x8xf32> -> vector<4x8x8xf32>
    %54 = tpu.transpose %52, [1, 0, 2] : vector<8x4x8xf32> -> vector<4x8x8xf32>
    %55 = vector.shape_cast %34 : vector<8x32xf32> to vector<8x4x8xf32>
    %56 = tpu.transpose %55, [1, 0, 2] : vector<8x4x8xf32> -> vector<4x8x8xf32>
    %57 = arith.truncf %53 : vector<4x8x8xf32> to vector<4x8x8xbf16>
    %58 = arith.truncf %54 : vector<4x8x8xf32> to vector<4x8x8xbf16>
    "tpu.trace_start"() <{level = 10 : i32, message = "ntd,nud->ntu"}> : () -> ()
    %cst_17 = arith.constant dense<0.000000e+00> : vector<4x8x8xf32>
    %59 = tpu.matmul %57, %58, %cst_17 {dimension_numbers = #tpu.dot_dimension_numbers<[2], [2], [1], [1], [0, 0, 0, 1, 1, 1], [0], [0]>} : vector<4x8x8xbf16>, vector<4x8x8xbf16>, vector<4x8x8xf32> -> vector<4x8x8xf32>
    "tpu.trace_stop"() : () -> ()
    %cst_18 = arith.constant 0.353553385 : f32
    %60 = vector.broadcast %cst_18 : f32 to vector<4x8x8xf32>
    %61 = arith.mulf %59, %60 : vector<4x8x8xf32>
    %62 = vector.shape_cast %11 : vector<8x8xf32> to vector<1x8x8xf32>
    %63 = vector.broadcast %62 : vector<1x8x8xf32> to vector<4x8x8xf32>
    %64 = arith.addf %61, %63 : vector<4x8x8xf32>
    %cst_19 = arith.constant dense<0xFF800000> : vector<4x8xf32>
    %65 = vector.multi_reduction <maximumf>, %64, %cst_19 [2] : vector<4x8x8xf32> to vector<4x8xf32>
    %66 = vector.shape_cast %65 : vector<4x8xf32> to vector<4x8x1xf32>
    %67 = vector.broadcast %66 : vector<4x8x1xf32> to vector<4x8x8xf32>
    %68 = arith.subf %64, %67 : vector<4x8x8xf32>
    %69 = math.exp %68 : vector<4x8x8xf32>
    %cst_20 = arith.constant dense<0.000000e+00> : vector<4x8xf32>
    %70 = vector.multi_reduction <add>, %69, %cst_20 [2] : vector<4x8x8xf32> to vector<4x8xf32>
    %71 = vector.shape_cast %70 : vector<4x8xf32> to vector<4x8x1xf32>
    %72 = tpu.reciprocal %71 {approx = true} : vector<4x8x1xf32> -> vector<4x8x1xf32>
    %73 = vector.broadcast %72 : vector<4x8x1xf32> to vector<4x8x8xf32>
    %74 = arith.mulf %69, %73 : vector<4x8x8xf32>
    %75 = arith.truncf %74 : vector<4x8x8xf32> to vector<4x8x8xbf16>
    %76 = arith.truncf %56 : vector<4x8x8xf32> to vector<4x8x8xbf16>
    "tpu.trace_start"() <{level = 10 : i32, message = "ntu,nud->ntd"}> : () -> ()
    %cst_21 = arith.constant dense<0.000000e+00> : vector<4x8x8xf32>
    %77 = tpu.matmul %75, %76, %cst_21 {dimension_numbers = #tpu.dot_dimension_numbers<[2], [1], [1], [2], [0, 0, 0, 1, 1, 2], [0], [0]>} : vector<4x8x8xbf16>, vector<4x8x8xbf16>, vector<4x8x8xf32> -> vector<4x8x8xf32>
    "tpu.trace_stop"() : () -> ()
    %78 = tpu.transpose %77, [1, 0, 2] : vector<4x8x8xf32> -> vector<8x4x8xf32>
    %79 = vector.shape_cast %78 : vector<8x4x8xf32> to vector<8x32xf32>
    %80 = arith.truncf %79 : vector<8x32xf32> to vector<8x32xbf16>
    %c0_22 = arith.constant 0 : index
    %c0_23 = arith.constant 0 : index
    %c0_24 = arith.constant 0 : index
    %81 = vector.load %arg7[%c0_22, %c0_23, %c0_24] : memref<1x32x32xbf16, #tpu.memory_space<vmem>>, vector<1x32x32xbf16>
    %82 = vector.shape_cast %81 : vector<1x32x32xbf16> to vector<32x32xbf16>
    %cst_25 = arith.constant dense<0.000000e+00> : vector<8x32xf32>
    %83 = tpu.matmul %80, %82, %cst_25 {dimension_numbers = #tpu.dot_dimension_numbers<[1], [0], [0], [1], [0, 0, 1, 1], [], []>} : vector<8x32xbf16>, vector<32x32xbf16>, vector<8x32xf32> -> vector<8x32xf32>
    %84 = arith.addf %3, %83 : vector<8x32xf32>
    %c0_26 = arith.constant 0 : index
    %c0_27 = arith.constant 0 : index
    %c0_28 = arith.constant 0 : index
    %85 = vector.load %arg8[%c0_26, %c0_27, %c0_28] : memref<1x1x32xf32, #tpu.memory_space<vmem>>, vector<1x1x32xf32>
    %86 = vector.shape_cast %85 : vector<1x1x32xf32> to vector<1x32xf32>
    %87 = arith.mulf %84, %84 : vector<8x32xf32>
    %cst_29 = arith.constant dense<0.000000e+00> : vector<8xf32>
    %88 = vector.multi_reduction <add>, %87, %cst_29 [1] : vector<8x32xf32> to vector<8xf32>
    %89 = vector.shape_cast %88 : vector<8xf32> to vector<8x1xf32>
    %cst_30 = arith.constant 3.200000e+01 : f32
    %90 = vector.broadcast %cst_30 : f32 to vector<8x1xf32>
    %91 = arith.divf %89, %90 : vector<8x1xf32>
    %cst_31 = arith.constant 9.99999974E-6 : f32
    %92 = vector.broadcast %cst_31 : f32 to vector<8x1xf32>
    %93 = arith.addf %91, %92 : vector<8x1xf32>
    %94 = math.rsqrt %93 : vector<8x1xf32>
    %95 = vector.broadcast %94 : vector<8x1xf32> to vector<8x32xf32>
    %96 = arith.mulf %84, %95 : vector<8x32xf32>
    %97 = vector.broadcast %86 : vector<1x32xf32> to vector<8x32xf32>
    %98 = arith.mulf %96, %97 : vector<8x32xf32>
    %99 = arith.truncf %98 : vector<8x32xf32> to vector<8x32xbf16>
    %c0_32 = arith.constant 0 : index
    %c0_33 = arith.constant 0 : index
    %c0_34 = arith.constant 0 : index
    %100 = vector.load %arg9[%c0_32, %c0_33, %c0_34] : memref<1x32x128xbf16, #tpu.memory_space<vmem>>, vector<1x32x128xbf16>
    %101 = vector.shape_cast %100 : vector<1x32x128xbf16> to vector<32x128xbf16>
    %cst_35 = arith.constant dense<0.000000e+00> : vector<8x128xf32>
    %102 = tpu.matmul %99, %101, %cst_35 {dimension_numbers = #tpu.dot_dimension_numbers<[1], [0], [0], [1], [0, 0, 1, 1], [], []>} : vector<8x32xbf16>, vector<32x128xbf16>, vector<8x128xf32> -> vector<8x128xf32>
    %103 = vector.extract_strided_slice %102 {offsets = [0, 0], sizes = [8, 64], strides = [1, 1]} : vector<8x128xf32> to vector<8x64xf32>
    %104 = vector.extract_strided_slice %102 {offsets = [0, 64], sizes = [8, 64], strides = [1, 1]} : vector<8x128xf32> to vector<8x64xf32>
    %105 = arith.negf %103 : vector<8x64xf32>
    %106 = math.exp %105 : vector<8x64xf32>
    %cst_36 = arith.constant 1.000000e+00 : f32
    %107 = vector.broadcast %cst_36 : f32 to vector<8x64xf32>
    %108 = arith.addf %107, %106 : vector<8x64xf32>
    %109 = arith.divf %107, %108 : vector<8x64xf32>
    %110 = arith.mulf %103, %109 : vector<8x64xf32>
    %111 = arith.mulf %110, %104 : vector<8x64xf32>
    %112 = arith.truncf %111 : vector<8x64xf32> to vector<8x64xbf16>
    %c0_37 = arith.constant 0 : index
    %c0_38 = arith.constant 0 : index
    %c0_39 = arith.constant 0 : index
    %113 = vector.load %arg10[%c0_37, %c0_38, %c0_39] : memref<1x64x32xbf16, #tpu.memory_space<vmem>>, vector<1x64x32xbf16>
    %114 = vector.shape_cast %113 : vector<1x64x32xbf16> to vector<64x32xbf16>
    %cst_40 = arith.constant dense<0.000000e+00> : vector<8x32xf32>
    %115 = tpu.matmul %112, %114, %cst_40 {dimension_numbers = #tpu.dot_dimension_numbers<[1], [0], [0], [1], [0, 0, 1, 1], [], []>} : vector<8x64xbf16>, vector<64x32xbf16>, vector<8x32xf32> -> vector<8x32xf32>
    %116 = arith.addf %84, %115 : vector<8x32xf32>
    %c0_41 = arith.constant 0 : index
    %c0_42 = arith.constant 0 : index
    %117 = vector.load %arg13[%c0_41, %c0_42] : memref<8x32xf32, #tpu.memory_space<vmem>>, vector<8x32xf32>
    tpu.vector_store %arg13[%c0_41, %c0_42], %116 {strides = array<i32>} : memref<8x32xf32, #tpu.memory_space<vmem>>, vector<8x32xf32>,
    %c1_i32 = arith.constant 1 : i32
    %118 = arith.cmpi eq, %arg1, %c1_i32 : i32
    %119 = arith.extui %118 : i1 to i32
    %c0_i32_43 = arith.constant 0 : i32
    %120 = arith.cmpi ne, %119, %c0_i32_43 : i32
    scf.if %120 {
      %c0_44 = arith.constant 0 : index
      %c0_45 = arith.constant 0 : index
      %121 = vector.load %arg11[%c0_44, %c0_45] : memref<1x32xf32, #tpu.memory_space<vmem>>, vector<1x32xf32>
      %122 = arith.mulf %116, %116 : vector<8x32xf32>
      %cst_46 = arith.constant dense<0.000000e+00> : vector<8xf32>
      %123 = vector.multi_reduction <add>, %122, %cst_46 [1] : vector<8x32xf32> to vector<8xf32>
      %124 = vector.shape_cast %123 : vector<8xf32> to vector<8x1xf32>
      %cst_47 = arith.constant 3.200000e+01 : f32
      %125 = vector.broadcast %cst_47 : f32 to vector<8x1xf32>
      %126 = arith.divf %124, %125 : vector<8x1xf32>
      %cst_48 = arith.constant 9.99999974E-6 : f32
      %127 = vector.broadcast %cst_48 : f32 to vector<8x1xf32>
      %128 = arith.addf %126, %127 : vector<8x1xf32>
      %129 = math.rsqrt %128 : vector<8x1xf32>
      %130 = vector.broadcast %129 : vector<8x1xf32> to vector<8x32xf32>
      %131 = arith.mulf %116, %130 : vector<8x32xf32>
      %132 = vector.broadcast %121 : vector<1x32xf32> to vector<8x32xf32>
      %133 = arith.mulf %131, %132 : vector<8x32xf32>
      %c0_49 = arith.constant 0 : index
      %c0_50 = arith.constant 0 : index
      %c0_51 = arith.constant 0 : index
      %134 = vector.load %arg12[%c0_49, %c0_50, %c0_51] : memref<1x8x32xf32, #tpu.memory_space<vmem>>, vector<1x8x32xf32>
      %135 = vector.shape_cast %134 : vector<1x8x32xf32> to vector<8x32xf32>
      %136 = vector.shape_cast %133 : vector<8x32xf32> to vector<1x8x32xf32>
      tpu.vector_store %arg12[%c0_49, %c0_50, %c0_51], %136 {strides = array<i32>} : memref<1x8x32xf32, #tpu.memory_space<vmem>>, vector<1x8x32xf32>,
    } else {
    }
    return
  }
  func.func @transform_0(%arg0: i32, %arg1: i32) -> (i32, i32, i32) {
    %c0_i32 = arith.constant 0 : i32
    %c0_i32_0 = arith.constant 0 : i32
    %c0_i32_1 = arith.constant 0 : i32
    return %arg0, %c0_i32, %c0_i32_0 : i32, i32, i32
  }
  func.func @transform_1(%arg0: i32, %arg1: i32) -> (i32, i32) {
    %c0_i32 = arith.constant 0 : i32
    %c0_i32_0 = arith.constant 0 : i32
    %c0_i32_1 = arith.constant 0 : i32
    return %c0_i32, %c0_i32_0 : i32, i32
  }
  func.func @transform_2(%arg0: i32, %arg1: i32) -> (i32, i32) {
    %c0_i32 = arith.constant 0 : i32
    %c0_i32_0 = arith.constant 0 : i32
    %c0_i32_1 = arith.constant 0 : i32
    return %c0_i32, %c0_i32_0 : i32, i32
  }
  func.func @transform_3(%arg0: i32, %arg1: i32) -> (i32, i32, i32) {
    %c0_i32 = arith.constant 0 : i32
    %c0_i32_0 = arith.constant 0 : i32
    %c0_i32_1 = arith.constant 0 : i32
    return %arg1, %c0_i32, %c0_i32_0 : i32, i32, i32
  }
  func.func @transform_4(%arg0: i32, %arg1: i32) -> (i32, i32, i32) {
    %c0_i32 = arith.constant 0 : i32
    %c0_i32_0 = arith.constant 0 : i32
    %c0_i32_1 = arith.constant 0 : i32
    return %arg1, %c0_i32, %c0_i32_0 : i32, i32, i32
  }
  func.func @transform_5(%arg0: i32, %arg1: i32) -> (i32, i32, i32) {
    %c0_i32 = arith.constant 0 : i32
    %c0_i32_0 = arith.constant 0 : i32
    %c0_i32_1 = arith.constant 0 : i32
    return %arg1, %c0_i32, %c0_i32_0 : i32, i32, i32
  }
  func.func @transform_6(%arg0: i32, %arg1: i32) -> (i32, i32, i32) {
    %c0_i32 = arith.constant 0 : i32
    %c0_i32_0 = arith.constant 0 : i32
    %c0_i32_1 = arith.constant 0 : i32
    return %arg1, %c0_i32, %c0_i32_0 : i32, i32, i32
  }
  func.func @transform_7(%arg0: i32, %arg1: i32) -> (i32, i32, i32) {
    %c0_i32 = arith.constant 0 : i32
    %c0_i32_0 = arith.constant 0 : i32
    %c0_i32_1 = arith.constant 0 : i32
    return %arg1, %c0_i32, %c0_i32_0 : i32, i32, i32
  }
  func.func @transform_8(%arg0: i32, %arg1: i32) -> (i32, i32, i32) {
    %c0_i32 = arith.constant 0 : i32
    %c0_i32_0 = arith.constant 0 : i32
    %c0_i32_1 = arith.constant 0 : i32
    return %arg1, %c0_i32, %c0_i32_0 : i32, i32, i32
  }
  func.func @transform_9(%arg0: i32, %arg1: i32) -> (i32, i32) {
    %c0_i32 = arith.constant 0 : i32
    %c0_i32_0 = arith.constant 0 : i32
    %c0_i32_1 = arith.constant 0 : i32
    return %c0_i32, %c0_i32_0 : i32, i32
  }
  func.func @transform_10(%arg0: i32, %arg1: i32) -> (i32, i32, i32) {
    %c0_i32 = arith.constant 0 : i32
    %c0_i32_0 = arith.constant 0 : i32
    %c0_i32_1 = arith.constant 0 : i32
    return %arg0, %c0_i32, %c0_i32_0 : i32, i32, i32
  }
}

</mosaic_0001>

<bundles_post_ra>
// kernel: tpu_custom_call.1
= control target key start
LH: loop header
LB: loop body
LE: loop exit
PB: predicated region body
PF: predicated region fallthrough
CT: control target
= control target key end

     0   :  { %s3356_s0 = inlined_call_operand.hbm [shape: f32[2,8,32], index: 0, kind: input, shape index: {}]   ;;  %s3357_s1 = inlined_call_operand.hbm [shape: f32[8,16], index: 1, kind: input, shape index: {}]   ;;  %s3358_s2 = inlined_call_operand.hbm [shape: f32[8,16], index: 2, kind: input, shape index: {}]   ;;  %s3359_s3 = inlined_call_operand.hbm [shape: f32[2,1,32], index: 3, kind: input, shape index: {}]   ;;  %s3360_s4 = inlined_call_operand.vmem [shape: bf16[2,32,96], index: 4, kind: input, shape index: {}]   ;;  %s3361_s5 = inlined_call_operand.vmem [shape: bf16[2,32,32], index: 5, kind: input, shape index: {}]   ;;  %s3362_s6 = inlined_call_operand.vmem [shape: f32[2,1,32], index: 6, kind: input, shape index: {}]   ;;  %s3363_s7 = inlined_call_operand.vmem [shape: bf16[2,32,128], index: 7, kind: input, shape index: {}]   ;;  %s3364_s8 = inlined_call_operand.vmem [shape: bf16[2,64,32], index: 8, kind: input, shape index: {}]   ;;  %s3365_s9 = inlined_call_operand.vmem [shape: f32[1,32], index: 9, kind: input, shape index: {}]   ;;  %s3366_s10 = inlined_call_operand.hbm [shape: f32[2,8,32], index: 10, kind: output, shape index: {}]  }
   0x1   :  { %3378 = sst [smem:[#allocation27_spill]] %s3356_s0 }
   0x2   :  { %3379 = sst [smem:[#allocation28_spill]] %s3357_s1 }
   0x3   :  { %3380 = sst [smem:[#allocation29_spill]] %s3358_s2 }
   0x4   :  { %3381 = sst [smem:[#allocation30_spill]] %s3359_s3 }
   0x5   :  { %3382 = sst [smem:[#allocation31_spill]] %s3363_s7 }
   0x6   :  { %3383 = sst [smem:[#allocation32_spill]] %s3364_s8 }
   0x7   :  { %3384 = sst [smem:[#allocation33_spill]] %s3365_s9 }
   0x8   :  { %3385 = sst [smem:[#allocation34_spill]] %s3366_s10 }
   0x9   :  { %15 = vsyncpa [#allocation4], 0 }
   0xa   :  { %17 = vsyncpa [#allocation4 + $0x1], 0 }
   0xb   :  { %18 = vsyncpa [#allocation7], 0 }
   0xc   :  { %19 = vsyncpa [#allocation10], 0 }
   0xd   :  { %21 = vsyncpa [#allocation10 + $0x1], 0 }
   0xe   :  { %22 = vsyncpa [#allocation5], 0 }
   0xf   :  { %24 = vsyncpa [#allocation5 + $0x1], 0  ;;  %s2717_s13 = smov 0   ;;  %s2719_s14 = smov 0  }
  0x10   :  { %s2721_s15 = smov 0   ;;  %s2723_s16 = smov 0  }
  0x11   :  { %s2725_s17 = smov 0   ;;  %s2727_s18 = smov 0  }
  0x12   :  { %s2729_s19 = smov 0   ;;  %s2731_s20 = smov 0  }
  0x13   :  { %s2733_s21 = smov 0   ;;  %s2735_s22 = smov 0  }
  0x14   :  { %s2737_s23 = smov 0  }
  0x15 LB: > { %3386 = sst [smem:[#allocation16_spill]] %s2612_s16  ;;  %s2023_s24 = sadd.s32 4294967295, %s2640_s23   ;;  %s2640_s23 = sphi %s2737_s23, %s30_s23   ;;  %s2636_s22 = sphi %s2735_s22, %s3432_s22   ;;  %s2632_s21 = sphi %s2733_s21, %s3426_s21   ;;  %s2628_s20 = sphi %s2731_s20, %s3425_s20   ;;  %s2624_s19 = sphi %s2729_s19, %s3424_s19   ;;  %s2620_s18 = sphi %s2727_s18, %s3423_s18   ;;  %s2616_s17 = sphi %s2725_s17, %s3422_s17   ;;  %s2612_s16 = sphi %s2723_s16, %s3431_s16   ;;  %s2608_s15 = sphi %s2721_s15, %s3430_s15   ;;  %s2604_s14 = sphi %s2719_s14, %s3429_s14   ;;  %s2600_s13 = sphi %s2717_s13, %s3428_s13  }
  0x16   : > { %3387 = sst [smem:[#allocation17_spill]] %s2616_s17  ;;  %p2025_p0 = scmp.ge.s32.totalorder %s2640_s23, 1 }
  0x17   : > { %3388 = sst [smem:[#allocation18_spill]] %s2620_s18  ;;  %p2774_p1 = scmp.eq.s32.totalorder %s2023_s24, 0 }
  0x18   : > { %3389 = sst [smem:[#allocation19_spill]] %s2628_s20  ;;  %p2778_p2 = scmp.eq.s32.totalorder %s2023_s24, 3 }
  0x19   : > { %3390 = sst [smem:[#allocation20_spill]] %s2632_s21  ;;  %p318_p3 = scmp.lt.s32.totalorder %s2640_s23, 5 }
  0x1a   : > { %3391 = sst [smem:[#allocation21_spill]] %s2636_s22  ;;  %s2642_s11 = smov [#allocation6]  }
  0x1b   : > { %s3394_s1 = sld [smem:[#allocation28_spill]]  ;;  %p2786_p4 = pnand %p2025_p0, %p318_p3 }
  0x1c   : > { %s332_s12 = sshll.u32 %s2642_s11, 4  ;;  %s3396_s2 = sld [smem:[#allocation29_spill]]  ;;  %s333_s12 = int_to_ptr.vmem [resolvable:$true] %s332_s12 }
  0x1d   : > { %p2131_p5 = pneg %p2786_p4  ;;  %s2024_s11 = sadd.s32 4294967294, %s2640_s23  }
  0x1e   : > { %p56_p7 = scmp.ne.s32.totalorder %s2620_s18, %s2616_s17  ;;  %p57_p8 = scmp.eq.s32.totalorder %s2640_s23, 0 }
  0x1f   : > { %p2132_p6 = pnand %p2131_p5, %p2774_p1  ;;  %p62_p9 = scmp.ne.s32.totalorder %s2616_s17, %s2612_s16 }
  0x20   : > { %p311_p10 = scmp.eq.s32.totalorder %s2024_s11, 3  ;;  %p2807_p11 = por %p57_p8, %p56_p7 }
  0x21   : > { %s330_s29 = sshll.u32 %s3394_s1, 4  ;;  %s2643_s1 = smov [#allocation8]   ;;  %s331_s29 = int_to_ptr.hbm [resolvable:$true] %s330_s29 }
  0x22   : > { %s342_s28 = sshll.u32 %s3396_s2, 4  ;;  %s344_s10 = sshll.u32 %s2643_s1, 4  ;;  %s343_s28 = int_to_ptr.hbm [resolvable:$true] %s342_s28  ;;  %s345_s10 = int_to_ptr.vmem [resolvable:$true] %s344_s10 }
  0x23   : > { %2134 = dma.hbm_to_vmem [thread:$0]  (!%p2132_p6), %s331_s29, 128, %s333_s12, [#allocation7]  }
  0x24   : > { %2137 = dma.hbm_to_vmem [thread:$0]  (!%p2132_p6), %s343_s28, 128, %s345_s10, [#allocation7]  }
  0x25   : > { %p2813_p12 = por %p2778_p2, %p56_p7  ;;  %p2819_p13 = por %p2774_p1, %p62_p9 }
  0x26   : > { %p2823_p0 = por %p311_p10, %p62_p9  ;;  %p2151_p3 = scmp.lt.s32.totalorder %s2640_s23, 4 }
  0x27   : > { %s3398_s1 = scalar_select %p2813_p12, 1, 0 }
  0x28   : > { %s3401_s29 = scalar_select %p2823_p0, 1, 0 }
  0x29   : > { %3399 = sst [smem:[#allocation22_spill]] %s3398_s1  ;;  %s358_s26 = sand.u32 1, %s2620_s18  }
  0x2a   : > { %3402 = sst [smem:[#allocation23_spill]] %s3401_s29  ;;  %s2029_s12 = sshll.u32 %s358_s26, 3 }
  0x2b   : > { %s2030_s27 = sshll.u32 %s2636_s22, 3  ;;  %s3403_s0 = sld [smem:[#allocation27_spill]] }
  0x2c   : > { %s362_s20 = scalar_lea.vmem [#allocation3], %s2029_s12  ;;  %p2139_p2 = pnand %p2151_p3, %p2807_p11 }
  0x2d   : > { %s370_s2 = sshll.u32 %s362_s20, 4  ;;  %s359_s16 = scalar_lea.sflag [#allocation4], %s358_s26  ;;  %s371_s2 = int_to_ptr.vmem [resolvable:$true] %s370_s2 }
  0x2e   : > { %s39_s28 = sadd.s32 1, %s2632_s21  ;;  %p124_p6 = scmp.ne.s32.totalorder %s2608_s15, %s2604_s14 }
  0x2f   : > { %p40_p5 = scmp.ge.s32.totalorder %s39_s28, 2  ;;  %p130_p7 = scmp.ne.s32.totalorder %s2604_s14, %s2600_s13 }
  0x30   : > { %p2852_p9 = por %p124_p6, %p57_p8  ;;  %s377_s13 = sand.u32 1, %s2608_s15  }
  0x31   : > { %s366_s9 = scalar_lea.hbm %s3403_s0, %s2030_s27  ;;  %s117_s27 = sadd.s32 1, %s2608_s15 }
  0x32   : > { %s368_s29 = sshll.u32 %s366_s9, 4  ;;  %s3434_s28 = smov (%p40_p5, %s39_s28), 0  ;;  %s369_s29 = int_to_ptr.hbm [resolvable:$true] %s368_s29 }
  0x33   : > { %2141 = dma.hbm_to_vmem [thread:$0]  (!%p2139_p2), %s369_s29, 128, %s371_s2, %s359_s16  }
  0x34   : > { %3404 = sst [smem:[#allocation24_spill]] %s3434_s28  ;;  %s3405_s9 = sadd.s32 1, %s2636_s22 }
  0x35   : > { %s3436_s9 = smov (!%p40_p5, %s3405_s9), %s2636_s22  ;;  %s114_s20 = ssub.s32 %s2632_s21, %s3434_s28 }
  0x36   : > { %p44_p10 = scmp.ge.s32.totalorder %s3436_s9, 2  ;;  %p115_p11 = scmp.eq.s32.totalorder %s114_s20, 0 }
  0x37   : > { %p2858_p2 = por %p130_p7, %p2774_p1  ;;  %s3409_s3 = sld [smem:[#allocation30_spill]] }
  0x38   : > { %s3438_s9 = smov (%p44_p10, %s3436_s9), 0  ;;  %s380_s0 = scalar_lea.vmem [#allocation9], %s377_s13 }
  0x39   : > { %3408 = sst [smem:[#allocation25_spill]] %s3438_s9  ;;  %s46_s29 = ssub.s32 %s2636_s22, %s3438_s9 }
  0x3a   : > { %s2866_s16 = scalar_select %p115_p11, %s2608_s15, %s117_s27  }
  0x3b   : > { %p47_p8 = scmp.eq.s32.totalorder %s46_s29, 0  ;;  %s387_s28 = sshll.u32 %s380_s0, 4  ;;  %s388_s28 = int_to_ptr.vmem [resolvable:$true] %s387_s28 }
  0x3c   : > { %s3410_s20 = sadd.s32 1, %s2620_s18  ;;  %p2142_p5 = pnand %p2151_p3, %p2852_p9 }
  0x3d   : > { %s383_s11 = scalar_lea.hbm %s3409_s3, %s2632_s21  ;;  %s378_s7 = scalar_lea.sflag [#allocation10], %s377_s13 }
  0x3e   : > { %s2877_s1 = scalar_select %p47_p8, %s2620_s18, %s3410_s20  }
  0x3f   : > { %s385_s8 = sshll.u32 %s383_s11, 4  ;;  %434 = sbr.rel (%p2786_p4) target bundleno = 2403 (0x963), region = 60  ;;  %s386_s8 = int_to_ptr.hbm [resolvable:$true] %s385_s8 }
  0x40   : > { %3411 = sst [smem:[#allocation26_spill]] %s2877_s1  ;;  %s2886_s27 = sand.u32 (!%p2786_p4), 1, %s2616_s17  }
  0x41   : > { %2144 = dma.hbm_to_vmem [thread:$0]  (!%p2142_p5), %s386_s8, 16, %s388_s28, %s378_s7  }
  0x42   : > { %s2032_s0 = sshll.u32 (!%p2786_p4), %s2886_s27, 3  ;;  %s437_s29 = scalar_lea.sflag (!%p2786_p4), [#allocation4], %s2886_s27 }
  0x43   : > { %s440_s26 = scalar_lea.vmem (!%p2786_p4), [#allocation3], %s2032_s0 }
  0x44   : > { %2583 = dma.done.wait (%p2819_p13), %s437_s29, 128  }
  0x45   : > { %2585 = vsyncadd (%p2819_p13), %s437_s29, 4294967168 }
  0x46   : > { %2587 = dma.done.wait (%p2774_p1), [#allocation7], 256  }
  0x47   : > { %2589 = vsyncadd (%p2774_p1), [#allocation7], 4294967040  ;;  %s456_s7 = sand.u32 1, %s2604_s14  }
  0x48   : > { %s457_s8 = scalar_lea.sflag [#allocation10], %s456_s7  ;;  %s2899_s30 = scalar_lea.vmem [#allocation9], %s456_s7 }
  0x49   : > { %2591 = dma.done.wait (%p2858_p2), %s457_s8, 16  }
  0x4a   : > { %2593 = vsyncadd (%p2858_p2), %s457_s8, 4294967280  ;;  %p524_p4 = scmp.lt.s32.totalorder %s2624_s19, 1  ;;  %s3412_s9 = sld [smem:[#allocation31_spill]] }
  0x4b   : > { %s3413_s17 = sld [smem:[#allocation32_spill]]  ;;  %s2933_s24 = scalar_lea.vmem [#allocation11], %s2032_s0 }
  0x4c   : > { %s2907_s10 = scalar_select %p524_p4, %s2624_s19, 1 }
  0x4d   : > { %p2044_p1 = scmp.ne.s32.totalorder %s2624_s19, 0 }
  0x4e   : > { %s2103_s25 = sshll.u32 %s2907_s10, 4  ;;  %s536_s13 = scalar_lea.vmem %s3362_s6, %s2907_s10 }
  0x4f   : > { %s528_s20 = scalar_lea.vmem %s3360_s4, %s2103_s25  ;;  %s2920_s7 = scalar_lea.vmem %s3361_s5, %s2103_s25 }
  0x50   : > { %s2925_s22 = scalar_lea.vmem %s3412_s9, %s2103_s25  ;;  %s2106_s21 = sshll.u32 %s2907_s10, 5 }
  0x51   : > { %s2931_s28 = scalar_lea.vmem %s3413_s17, %s2106_s21  ;;  %551 = sbr.rel (%p2044_p1) target bundleno = 88 (0x58), region = 80 }
  0x56   : > { %v552_v0 = vld [vmem:[%s440_s26] sm:$0xff]  ;;  %vm553_vm0 = vcmask 261120  }
  0x57   : > { %554 = vst.msk [vmem:[#allocation2] sm:$0xff] %vm553_vm0, %v552_v0 }
  0x58 PF: > { %vm566_vm1 = vcmask 261120   ;;  %v2644_v4 = vmov 32.0   ;;  %v2108_v8 = vld [vmem:[%s528_s20 + $0x8] sm:$0xff]  ;;  %v2107_v10 = vld [vmem:[%s528_s20] sm:$0xff]  ;;  %s2645_s3 = smov 48   ;;  %s2646_s17 = smov 32  }
  0x59   : > { %2360 = vrcp.f32 %v2644_v4  ;;  %620 = vmatpush.bf16.msra.mxu0 %v2108_v8  ;;  %v557_v12 = vld [vmem:[#allocation8] sm:$0xff]  ;;  %v2941_v17 = vld [vmem:[#allocation6] sm:$0xff]  ;;  %s2647_s18 = smov 16   ;;  %s2648_s21 = smov 112   ;;  %vm686_vm6 = vcmask 1047556   ;;  %vm849_vm7 = vcmask 31744  }
  0x5a   : > { %653 = vrot.lane.b32.xlu1 %v557_v12, %s2645_s3  ;;  %v2358_v24 = vld [vmem:[%s2899_s30] ss:$0 sm:$0xff]  ;;  %s2649_s1 = smov 116   ;;  %s2650_s9 = smov 120   ;;  %vm1297_vm8 = vcmask 64512   ;;  %vm1437_vm10 = vcmask 1043456  }
  0x5b   : > { %s2651_s0 = smov 124   ;;  %s2652_s26 = smov 80   ;;  %vm1634_vm11 = vcmask 130048   ;;  %vm1636_vm12 = vcmask 195584  }
  0x5c   : > { %s2653_s30 = smov 96   ;;  %s2656_s25 = smov 4  }
  0x5d   : > { %621 = vmatpush.bf16.msra.mxu0 %v2107_v10  ;;  %s2657_s12 = smov 104   ;;  %s2659_s11 = smov 64  }
  0x5e   : > { %v555_v1 = vld [vmem:[#allocation2] sm:$0xff]  ;;  %s2660_s20 = smov 8   ;;  %s2661_s29 = smov 24  }
  0x5f   : > { %v565_v2 = vmul.f32 %v555_v1, %v555_v1  ;;  %v2361_v5 = vpop.eup %2360  ;;  %p2098_p13 = scmp.ne.s32.totalorder %s2624_s19, 1 }
  0x60   : > { %v571_v6 = vmul.f32 32.0, %v2361_v5  ;;  %vm575_vm2 = vweird.f32 %v2361_v5  ;;  %s3414_s10 = sld [smem:[#allocation33_spill]] (!%p2098_p13) }
  0x61   : > { %v567_v3 = vsel %vm566_vm1, %v565_v2, 0.0 }
  0x62   : > { %568 = vadd.xlane.f32.xlu0 %v567_v3  ;;  %v572_v7 = vsub.f32 1.0, %v571_v6  ;;  %662 = vrot.lane.b32.xlu1 %v2941_v17, %s2645_s3 }
  0x64   : > { %v573_v9 = vmul.f32 %v2361_v5, %v572_v7 }
  0x66   : > { %v574_v11 = vadd.f32 %v2361_v5, %v573_v9  ;;  %v2654_v9 = vmov 1983009808  }
  0x67   : > { %v691_v10 = vunpack.c.l.s4 %v2654_v9 }
  0x68   : > { %v2937_v13 = vsel %vm575_vm2, %v2361_v5, %v574_v11 }
  0x76   : > { %666 = vrot.lane.b32.xlu0 %v557_v12, %s2646_s17 }
  0xcc   : > { %v654_v33 = vpop.permute.xlu1 %653 }
  0xd4   : > { %v663_v37 = vpop.permute.xlu1 %662 }
  0xd5   : > { %v569_v14 = vpop.xlane.xlu0 %568 }
  0xd6   : > { %v577_v15 = vmul.f32 %v2937_v13, %v569_v14 }
  0xd8   : > { %v578_v16 = vadd.f32 1e-05, %v577_v15 }
  0xda   : > { %2362 = vrsqrt.f32 %v578_v16  ;;  %vm585_vm4 = vweird.f32 %v578_v16 }
  0xe0   : > { %v2363_v18 = vpop.eup %2362 }
  0xe1   : > { %v580_v19 = vmul.f32 %v2363_v18, %v578_v16  ;;  %vm586_vm3 = vweird.f32 %v2363_v18  ;;  %v2982_v16 = vunpack.c.0.s8 %v691_v10 }
  0xe2   : > { %vm587_vm5 = vmor %vm585_vm4, %vm586_vm3 }
  0xe3   : > { %v581_v20 = vmul.f32 %v2363_v18, %v580_v19 }
  0xe5   : > { %v582_v21 = vmul.f32 0.5, %v581_v20 }
  0xe7   : > { %v583_v22 = vsub.f32 1.5, %v582_v21  ;;  %v2655_v21 = vmov 1934713408  }
  0xe8   : > { %v667_v29 = vpop.permute.xlu0 %666 }
  0xe9   : > { %v584_v23 = vmul.f32 %v2363_v18, %v583_v22  ;;  %v715_v22 = vunpack.c.l.s4 %v2655_v21 }
  0xeb   : > { %v588_v25 = vsel %vm587_vm5, %v2363_v18, %v584_v23  ;;  %vm1785_vm5 = vcmask 523264  }
  0xec   : > { %v589_v26 = vmul.f32 %v588_v25, %v555_v1 }
  0xee   : > { %v593_v27 = vmul.f32 %v2358_v24, %v589_v26 }
  0xf0   : > { %v594_v28 = vpack.c.bf16 %v593_v27, %v593_v27 }
  0xf2   : > { %2053 = vmatmul.msk.bf16.vlgmr.msra.gmra.mxu0 %vm566_vm1, %v594_v28 }
 0x16f   : > { %v2946_v30 = vpop.f32.mrf.mxu0 }
 0x170   : > { %v669_v31 = vmul.f32 %v667_v29, %v2946_v30  ;;  %v643_v32 = vmul.f32 %v2946_v30, %v557_v12  ;;  %v656_v35 = vmul.f32 %v654_v33, %v2946_v30  ;;  %v665_v39 = vmul.f32 %v663_v37, %v2946_v30 }
 0x171   : > { %v627_v4 = vmul.f32 %v2946_v30, %v2941_v17 }
 0x172   : > { %645 = vrot.lane.b32.xlu1 %v643_v32, %s2647_s18  ;;  %671 = vrot.lane.b32.xlu2 %v669_v31, %s2647_s18 }
 0x177   : > { %v625_v34 = vpop.f32.mrf.mxu0 }
 0x17a   : > { %658 = vrot.lane.b32.xlu1 %v656_v35, %s2648_s21  ;;  %639 = vrot.lane.b32.xlu2 %v2941_v17, %s2647_s18 }
 0x182   : > { %649 = vrot.lane.b32.xlu2 %v2941_v17, %s2646_s17 }
 0x1cc   : > { %v672_v36 = vpop.permute.xlu2 %671 }
 0x1cd   : > { %v674_v42 = vadd.f32 %v672_v36, %v665_v39  ;;  %v2992_v36 = vunpack.c.0.s8 %v715_v22 }
 0x1d4   : > { %v640_v38 = vpop.permute.xlu2 %639 }
 0x1d5   : > { %v642_v40 = vmul.f32 %v640_v38, %v2946_v30 }
 0x1dc   : > { %v650_v45 = vpop.permute.xlu2 %649 }
 0x1dd   : > { %v652_v47 = vmul.f32 %v650_v45, %v2946_v30 }
 0x1e4   : > { %v646_v41 = vpop.permute.xlu1 %645 }
 0x1e5   : > { %v648_v43 = vadd.f32 %v646_v41, %v642_v40 }
 0x1e7   : > { %v2273_v44 = vpack.i.bf16 %v648_v43, %v674_v42 }
 0x1e9   : > { %2274 = vrot.lane.b32.xlu1 %v2273_v44, %s2649_s1  ;;  %2269 = vrot.lane.b32.xlu0 %v2273_v44, %s2650_s9 }
 0x1ea   : > { %2264 = vrot.lane.b32.xlu2 %v2273_v44, %s2651_s0 }
 0x1ec   : > { %v659_v46 = vpop.permute.xlu1 %658 }
 0x1ed   : > { %v661_v48 = vsub.f32 %v652_v47, %v659_v46 }
 0x1f1   : > { %859 = vrot.lane.b32.xlu1 %v661_v48, %s2651_s0 }
 0x1f2   : > { %629 = vrot.lane.b32.xlu2 %v557_v12, %s2647_s18 }
 0x1f9   : > { %863 = vrot.lane.b32.xlu1 %v661_v48, %s2649_s1 }
 0x1fa   : > { %861 = vrot.lane.b32.xlu2 %v661_v48, %s2650_s9 }
 0x244   : > { %v2265_v49 = vpop.permute.xlu2 %2264 }
 0x245   : > { %v2266_v50 = vunpack.i.l.bf16 %v2265_v49  ;;  %v2267_v62 = vunpack.i.h.bf16 %v2265_v49 }
 0x247   : > { %v2278_v51 = vpack.i.bf16 %v2266_v50, %v674_v42  ;;  %v2288_v0 = vpack.i.bf16 %v2267_v62, %v648_v43 }
 0x249   : > { %2279 = vrot.lane.b32.xlu0 %v2278_v51, %s2652_s26 }
 0x24c   : > { %v630_v52 = vpop.permute.xlu2 %629 }
 0x24d   : > { %v632_v53 = vmul.f32 %v630_v52, %v2946_v30 }
 0x24f   : > { %634 = vrot.lane.b32.xlu2 %v632_v53, %s2648_s21 }
 0x254   : > { %v862_v2 = vpop.permute.xlu2 %861 }
 0x25b   : > { %v2275_v54 = vpop.permute.xlu1 %2274  ;;  %v2270_v55 = vpop.permute.xlu0 %2269 }
 0x25c   : > { %v2277_v56 = vunpack.i.h.bf16 %v2275_v54  ;;  %v2276_v57 = vunpack.i.l.bf16 %v2275_v54  ;;  %v2272_v58 = vunpack.i.h.bf16 %v2270_v55  ;;  %v2271_v59 = vunpack.i.l.bf16 %v2270_v55 }
 0x25e   : > { %v2293_v60 = vpack.i.bf16 %v2277_v56, %v2272_v58  ;;  %v2283_v61 = vpack.i.bf16 %v2276_v57, %v2271_v59 }
 0x260   : > { %2294 = vrot.lane.b32.xlu1 %v2293_v60, %s2648_s21  ;;  %2284 = vrot.lane.b32.xlu0 %v2283_v61, %s2652_s26 }
 0x263   : > { %v860_v63 = vpop.permute.xlu1 %859 }
 0x264   : > { %v2298_v7 = vpack.i.bf16 %v860_v63, %v661_v48 }
 0x268   : > { %2289 = vrot.lane.b32.xlu0 %v2288_v0, %s2648_s21 }
 0x26b   : > { %v864_v1 = vpop.permute.xlu1 %863 }
 0x26c   : > { %v2303_v3 = vpack.i.bf16 %v864_v1, %v862_v2 }
 0x270   : > { %2304 = vrot.lane.b32.xlu0 %v2303_v3, %s2653_s30 }
 0x2a9   : > { %v635_v5 = vpop.permute.xlu2 %634 }
 0x2aa   : > { %v2974_v6 = vsub.f32 %v627_v4, %v635_v5 }
 0x2ac   : > { %679 = vrot.lane.b32.xlu2 %v2974_v6, %s2650_s9  ;;  %676 = vrot.lane.b32.xlu1 %v2974_v6, %s2651_s0 }
 0x2b4   : > { %2299 = vrot.lane.b32.xlu2 %v2298_v7, %s2653_s30  ;;  %682 = vrot.lane.b32.xlu1 %v2974_v6, %s2649_s1 }
 0x2bb   : > { %v2280_v8 = vpop.permute.xlu0 %2279 }
 0x2bc   : > { %v2282_v11 = vunpack.i.h.bf16 %v2280_v8  ;;  %v2281_v12 = vunpack.i.l.bf16 %v2280_v8 }
 0x2be   : > { %v966_v19 = vrot.slane %v2282_v11, 4  ;;  %v954_v20 = vrot.slane %v2281_v12, 4 }
 0x2d2   : > { %v2285_v14 = vpop.permute.xlu0 %2284  ;;  %v2295_v15 = vpop.permute.xlu1 %2294 }
 0x2d3   : > { %v2287_v17 = vunpack.i.h.bf16 %v2285_v14  ;;  %v2286_v18 = vunpack.i.l.bf16 %v2285_v14  ;;  %v2297_v25 = vunpack.i.h.bf16 %v2295_v15  ;;  %v2296_v26 = vunpack.i.l.bf16 %v2295_v15 }
 0x2d5   : > { %v964_v23 = vrot.slane %v2287_v17, 4  ;;  %v952_v24 = vrot.slane %v2286_v18, 4  ;;  %v955_v27 = vsel %vm686_vm6, %v2286_v18, %v954_v20  ;;  %v967_v28 = vsel %vm686_vm6, %v2287_v17, %v966_v19 }
 0x2d6   : > { %v963_v31 = vperm.slane %v955_v27, %v2982_v16  ;;  %v975_v33 = vperm.slane %v967_v28, %v2982_v16  ;;  %v773_v39 = vrot.slane %v2297_v25, 4  ;;  %v761_v40 = vrot.slane %v2296_v26, 4 }
 0x2d7   : > { %v953_v29 = vsel %vm686_vm6, %v952_v24, %v2281_v12  ;;  %v965_v32 = vsel %vm686_vm6, %v964_v23, %v2282_v11 }
 0x2d8   : > { %v959_v34 = vperm.slane %v953_v29, %v2982_v16  ;;  %v971_v35 = vperm.slane %v965_v32, %v2982_v16  ;;  %v988_v37 = vrot.slane %v975_v33, 4  ;;  %v990_v38 = vrot.slane %v963_v31, 4 }
 0x2da   : > { %v976_v41 = vrot.slane %v971_v35, 4  ;;  %v978_v42 = vrot.slane %v959_v34, 4  ;;  %v2290_v43 = vpop.permute.xlu0 %2289  ;;  %v991_v46 = vsel %vm686_vm6, %v975_v33, %v990_v38  ;;  %v989_v47 = vsel %vm686_vm6, %v988_v37, %v963_v31 }
 0x2db   : > { %v2292_v44 = vunpack.i.h.bf16 %v2290_v43  ;;  %v2291_v45 = vunpack.i.l.bf16 %v2290_v43  ;;  %v999_v49 = vperm.slane %v991_v46, %v2992_v36  ;;  %v995_v50 = vperm.slane %v989_v47, %v2992_v36 }
 0x2dc   : > { %v979_v48 = vsel %vm686_vm6, %v971_v35, %v978_v42  ;;  %v977_v51 = vsel %vm686_vm6, %v976_v41, %v959_v34 }
 0x2dd   : > { %v774_v52 = vsel %vm686_vm6, %v773_v39, %v2292_v44  ;;  %v775_v53 = vrot.slane %v2292_v44, 4  ;;  %v762_v54 = vsel %vm686_vm6, %v761_v40, %v2291_v45  ;;  %v763_v55 = vrot.slane %v2291_v45, 4 }
 0x2de   : > { %v780_v56 = vperm.slane %v774_v52, %v2982_v16  ;;  %v768_v57 = vperm.slane %v762_v54, %v2982_v16  ;;  %v987_v58 = vperm.slane %v979_v48, %v2992_v36  ;;  %v1006_v59 = vrot.slane %v999_v49, 4 }
 0x2df   : > { %v776_v60 = vsel %vm686_vm6, %v2297_v25, %v775_v53  ;;  %v764_v61 = vsel %vm686_vm6, %v2296_v26, %v763_v55  ;;  %v983_v62 = vperm.slane %v977_v51, %v2992_v36  ;;  %v1004_v63 = vrot.slane %v995_v50, 4 }
 0x2e0   : > { %v784_v0 = vperm.slane %v776_v60, %v2982_v16  ;;  %v772_v1 = vperm.slane %v764_v61, %v2982_v16  ;;  %v787_v2 = vrot.slane %v768_v57, 4  ;;  %v785_v3 = vrot.slane %v780_v56, 4 }
 0x2e1   : > { %v2308_v4 = vpack.i.bf16 %v987_v58, %v999_v49  ;;  %v1007_v5 = vsel %vm686_vm6, 0.0, %v1006_v59  ;;  %v1000_v7 = vrot.slane %v983_v62, 4  ;;  %v1002_v11 = vrot.slane %v987_v58, 4 }
 0x2e2   : > { %v797_v8 = vrot.slane %v784_v0, 4  ;;  %v799_v9 = vrot.slane %v772_v1, 4  ;;  %v2313_v10 = vpack.i.bf16 %v1007_v5, %v995_v50  ;;  %v1005_v14 = vsel %vm686_vm6, 0.0, %v1004_v63  ;;  %v2305_v44 = vpop.permute.xlu0 %2304 }
 0x2e3   : > { %2309 = vrot.lane.b32.xlu0 %v2308_v4, %s2656_s25  ;;  %v1001_v12 = vsel %vm686_vm6, 0.0, %v1000_v7  ;;  %v788_v15 = vsel %vm686_vm6, %v780_v56, %v787_v2  ;;  %v1003_v21 = vsel %vm686_vm6, 0.0, %v1002_v11  ;;  %v786_v22 = vsel %vm686_vm6, %v785_v3, %v768_v57 }
 0x2e4   : > { %2314 = vrot.lane.b32.xlu2 %v2313_v10, %s2656_s25  ;;  %v2333_v17 = vpack.i.bf16 %v1001_v12, %v1005_v14  ;;  %v796_v18 = vperm.slane %v788_v15, %v2992_v36  ;;  %v800_v19 = vsel %vm686_vm6, %v784_v0, %v799_v9  ;;  %v798_v24 = vsel %vm686_vm6, %v797_v8, %v772_v1 }
 0x2e5   : > { %v808_v20 = vperm.slane %v800_v19, %v2992_v36  ;;  %v804_v25 = vperm.slane %v798_v24, %v2992_v36  ;;  %v2323_v27 = vpack.i.bf16 %v1003_v21, %v983_v62  ;;  %v792_v28 = vperm.slane %v786_v22, %v2992_v36 }
 0x2e6   : > { %2334 = vrot.lane.b32.xlu1 %v2333_v17, %s2656_s25  ;;  %v811_v23 = vrot.slane %v796_v18, 4  ;;  %v2307_v46 = vunpack.i.h.bf16 %v2305_v44  ;;  %v2306_v49 = vunpack.i.l.bf16 %v2305_v44  ;;  %v688_v63 = vrot.slane %v2974_v6, 4 }
 0x2e7   : > { %v2318_v26 = vpack.i.bf16 %v796_v18, %v808_v20  ;;  %v815_v31 = vrot.slane %v808_v20, 4  ;;  %v813_v32 = vrot.slane %v804_v25, 4  ;;  %v809_v34 = vrot.slane %v792_v28, 4 }
 0x2e8   : > { %v812_v29 = vsel %vm686_vm6, 0.0, %v811_v23  ;;  %v889_v50 = vrot.slane %v2307_v46, 4  ;;  %v877_v54 = vrot.slane %v2306_v49, 4 }
 0x2e9   : > { %v2338_v33 = vpack.i.bf16 %v812_v29, %v792_v28  ;;  %v816_v35 = vsel %vm686_vm6, 0.0, %v815_v31  ;;  %v814_v37 = vsel %vm686_vm6, 0.0, %v813_v32  ;;  %v810_v39 = vsel %vm686_vm6, 0.0, %v809_v34 }
 0x2ea   : > { %v2328_v38 = vpack.i.bf16 %v816_v35, %v804_v25  ;;  %v2343_v40 = vpack.i.bf16 %v810_v39, %v814_v37 }
 0x2eb   : > { %2324 = vrot.lane.b32.xlu0 %v2323_v27, %s2656_s25 }
 0x2ec   : > { %2319 = vrot.lane.b32.xlu2 %v2318_v26, %s2656_s25 }
 0x2ee   : > { %2339 = vrot.lane.b32.xlu1 %v2338_v33, %s2656_s25 }
 0x2f3   : > { %2329 = vrot.lane.b32.xlu0 %v2328_v38, %s2656_s25 }
 0x2f4   : > { %2344 = vrot.lane.b32.xlu2 %v2343_v40, %s2656_s25 }
 0x2f6   : > { %1163 = vrot.lane.b32.xlu1 %v2946_v30, %s2648_s21 }
 0x2fb   : > { %1161 = vrot.lane.b32.xlu0 %v2946_v30, %s2650_s9 }
 0x2fc   : > { %1165 = vrot.lane.b32.xlu2 %v2946_v30, %s2657_s12 }
 0x306   : > { %v680_v41 = vpop.permute.xlu2 %679 }
 0x307   : > { %v685_v62 = vrot.slane %v680_v41, 4  ;;  %v689_v2 = vsel %vm686_vm6, %v680_v41, %v688_v63 }
 0x308   : > { %v697_v11 = vperm.slane %v689_v2, %v2982_v16 }
 0x309   : > { %v687_v8 = vsel %vm686_vm6, %v685_v62, %v2974_v6 }
 0x30a   : > { %v693_v18 = vperm.slane %v687_v8, %v2982_v16  ;;  %v724_v21 = vrot.slane %v697_v11, 4 }
 0x30c   : > { %v712_v26 = vrot.slane %v693_v18, 4 }
 0x30e   : > { %v2300_v42 = vpop.permute.xlu2 %2299 }
 0x30f   : > { %v2301_v45 = vunpack.i.l.bf16 %v2300_v42  ;;  %v2302_v47 = vunpack.i.h.bf16 %v2300_v42 }
 0x311   : > { %v879_v48 = vrot.slane %v2301_v45, 4  ;;  %v891_v51 = vrot.slane %v2302_v47, 4  ;;  %v890_v55 = vsel %vm686_vm6, %v889_v50, %v2302_v47  ;;  %v878_v56 = vsel %vm686_vm6, %v877_v54, %v2301_v45 }
 0x312   : > { %v896_v60 = vperm.slane %v890_v55, %v2982_v16  ;;  %v884_v0 = vperm.slane %v878_v56, %v2982_v16 }
 0x313   : > { %v880_v52 = vsel %vm686_vm6, %v2306_v49, %v879_v48  ;;  %v892_v59 = vsel %vm686_vm6, %v2307_v46, %v891_v51 }
 0x314   : > { %v888_v57 = vperm.slane %v880_v52, %v2982_v16  ;;  %v900_v3 = vperm.slane %v892_v59, %v2982_v16  ;;  %v901_v7 = vrot.slane %v896_v60, 4  ;;  %v903_v12 = vrot.slane %v884_v0, 4 }
 0x316   : > { %v915_v4 = vrot.slane %v888_v57, 4  ;;  %v913_v15 = vrot.slane %v900_v3, 4  ;;  %v902_v19 = vsel %vm686_vm6, %v901_v7, %v884_v0  ;;  %v904_v23 = vsel %vm686_vm6, %v896_v60, %v903_v12 }
 0x317   : > { %v3063_v25 = vperm.slane %v902_v19, %v2992_v36  ;;  %v912_v29 = vperm.slane %v904_v23, %v2992_v36 }
 0x318   : > { %v916_v17 = vsel %vm686_vm6, %v900_v3, %v915_v4  ;;  %v914_v24 = vsel %vm686_vm6, %v913_v15, %v888_v57 }
 0x319   : > { %v924_v6 = vperm.slane %v916_v17, %v2992_v36  ;;  %v920_v31 = vperm.slane %v914_v24, %v2992_v36  ;;  %v925_v39 = vrot.slane %v3063_v25, 4  ;;  %v927_v44 = vrot.slane %v912_v29, 4 }
 0x31b   : > { %v931_v32 = vrot.slane %v924_v6, 4  ;;  %v929_v48 = vrot.slane %v920_v31, 4  ;;  %v926_v52 = vsel %vm686_vm6, 0.0, %v925_v39 }
 0x31d   : > { %v932_v45 = vsel %vm686_vm6, 0.0, %v931_v32  ;;  %v930_v0 = vsel %vm686_vm6, 0.0, %v929_v48 }
 0x31e   : > { %v677_v43 = vpop.permute.xlu1 %676 }
 0x31f   : > { %v700_v61 = vrot.slane %v677_v43, 4 }
 0x326   : > { %v683_v53 = vpop.permute.xlu1 %682 }
 0x327   : > { %v698_v58 = vrot.slane %v683_v53, 4  ;;  %v701_v1 = vsel %vm686_vm6, %v683_v53, %v700_v61 }
 0x328   : > { %v709_v9 = vperm.slane %v701_v1, %v2982_v16  ;;  %v928_v1 = vsel %vm686_vm6, 0.0, %v927_v44 }
 0x329   : > { %v699_v5 = vsel %vm686_vm6, %v698_v58, %v677_v43 }
 0x32a   : > { %v705_v14 = vperm.slane %v699_v5, %v2982_v16  ;;  %v722_v20 = vrot.slane %v709_v9, 4  ;;  %v725_v27 = vsel %vm686_vm6, %v709_v9, %v724_v21 }
 0x32b   : > { %v733_v35 = vperm.slane %v725_v27, %v2992_v36 }
 0x32c   : > { %v710_v22 = vrot.slane %v705_v14, 4  ;;  %v723_v28 = vsel %vm686_vm6, %v722_v20, %v697_v11  ;;  %v713_v33 = vsel %vm686_vm6, %v705_v14, %v712_v26 }
 0x32d   : > { %v3074_v40 = vperm.slane %v723_v28, %v2992_v36  ;;  %v721_v41 = vperm.slane %v713_v33, %v2992_v36  ;;  %v740_v49 = vrot.slane %v733_v35, 4 }
 0x32e   : > { %v711_v34 = vsel %vm686_vm6, %v710_v22, %v693_v18 }
 0x32f   : > { %v717_v42 = vperm.slane %v711_v34, %v2992_v36  ;;  %v738_v54 = vrot.slane %v3074_v40, 4  ;;  %v736_v61 = vrot.slane %v721_v41, 4  ;;  %v741_v5 = vsel %vm686_vm6, 0.0, %v740_v49 }
 0x331   : > { %v734_v58 = vrot.slane %v717_v42, 4  ;;  %v739_v12 = vsel %vm686_vm6, 0.0, %v738_v54  ;;  %v737_v18 = vsel %vm686_vm6, 0.0, %v736_v61 }
 0x333   : > { %v735_v11 = vsel %vm686_vm6, 0.0, %v734_v58 }
 0x33e   : > { %v2315_v10 = vpop.permute.xlu2 %2314 }
 0x33f   : > { %v2317_v37 = vunpack.i.h.bf16 %v2315_v10  ;;  %v2316_v46 = vunpack.i.l.bf16 %v2315_v10 }
 0x341   : > { %v1047_v50 = vsel %vm849_vm7, %v932_v45, %v2317_v37  ;;  %v1044_v63 = vsel %vm849_vm7, %v920_v31, %v2316_v46 }
 0x342   : > { %v1122_v62 = vrot.slane %v1047_v50, 4 }
 0x346   : > { %v2320_v38 = vpop.permute.xlu2 %2319 }
 0x347   : > { %v2322_v51 = vunpack.i.h.bf16 %v2320_v38  ;;  %v2321_v53 = vunpack.i.l.bf16 %v2320_v38 }
 0x349   : > { %v852_v2 = vsel %vm849_vm7, %v721_v41, %v2322_v51  ;;  %v856_v7 = vsel %vm849_vm7, %v733_v35, %v2321_v53 }
 0x34a   : > { %v1060_v23 = vrot.slane %v856_v7, 4 }
 0x34e   : > { %v2345_v14 = vpop.permute.xlu2 %2344 }
 0x34f   : > { %v2347_v27 = vunpack.i.h.bf16 %v2345_v14  ;;  %v2346_v38 = vunpack.i.l.bf16 %v2345_v14 }
 0x351   : > { %v851_v51 = vsel %vm849_vm7, %v735_v11, %v2347_v27 }
 0x355   : > { %v2310_v43 = vpop.permute.xlu0 %2309 }
 0x356   : > { %v2311_v47 = vunpack.i.l.bf16 %v2310_v43  ;;  %v2312_v55 = vunpack.i.h.bf16 %v2310_v43 }
 0x358   : > { %v1046_v56 = vsel %vm849_vm7, %v924_v6, %v2311_v47  ;;  %v2335_v57 = vpop.permute.xlu1 %2334  ;;  %v1042_v8 = vsel %vm849_vm7, %v912_v29, %v2312_v55  ;;  %v1048_v6 = vrot.slane %v852_v2, 4 }
 0x359   : > { %v1116_v59 = vrot.slane %v1046_v56, 4  ;;  %v2336_v60 = vunpack.i.l.bf16 %v2335_v57  ;;  %v2337_v19 = vunpack.i.h.bf16 %v2335_v57  ;;  %v1104_v24 = vrot.slane %v1042_v8, 4 }
 0x35b   : > { %v1117_v3 = vsel %vm686_vm6, %v1116_v59, %v1044_v63  ;;  %v1045_v4 = vsel %vm849_vm7, %v930_v0, %v2336_v60  ;;  %v1041_v39 = vsel %vm849_vm7, %v926_v52, %v2337_v19 }
 0x35c   : > { %v1121_v9 = vperm.slane %v1117_v3, %v2982_v16  ;;  %v1123_v10 = vsel %vm686_vm6, %v1122_v62, %v1045_v4  ;;  %v855_v62 = vsel %vm849_vm7, %v739_v12, %v2346_v38 }
 0x35d   : > { %v1127_v15 = vperm.slane %v1123_v10, %v2982_v16  ;;  %v2325_v17 = vpop.permute.xlu0 %2324 }
 0x35e   : > { %v2327_v20 = vunpack.i.h.bf16 %v2325_v17  ;;  %v2326_v21 = vunpack.i.l.bf16 %v2325_v17  ;;  %v1142_v22 = vrot.slane %v1121_v9, 4 }
 0x35f   : > { %v1140_v26 = vrot.slane %v1127_v15, 4 }
 0x360   : > { %v1043_v28 = vsel %vm849_vm7, %v928_v1, %v2327_v20  ;;  %v1040_v29 = vsel %vm849_vm7, %v3063_v25, %v2326_v21  ;;  %v2340_v31 = vpop.permute.xlu1 %2339  ;;  %v1143_v32 = vsel %vm686_vm6, %v1127_v15, %v1142_v22 }
 0x361   : > { %v1110_v33 = vrot.slane %v1043_v28, 4  ;;  %v1105_v34 = vsel %vm686_vm6, %v1104_v24, %v1040_v29  ;;  %v2342_v35 = vunpack.i.h.bf16 %v2340_v31  ;;  %v2341_v37 = vunpack.i.l.bf16 %v2340_v31 }
 0x362   : > { %v1109_v41 = vperm.slane %v1105_v34, %v2982_v16  ;;  %v1141_v43 = vsel %vm686_vm6, %v1140_v26, %v1121_v9  ;;  %v1151_v46 = vperm.slane %v1143_v32, %v2992_v36 }
 0x363   : > { %v1111_v44 = vsel %vm686_vm6, %v1110_v33, %v1041_v39  ;;  %v853_v45 = vsel %vm849_vm7, %v737_v18, %v2342_v35  ;;  %v850_v25 = vsel %vm849_vm7, %v717_v42, %v2341_v37  ;;  %v1147_v54 = vperm.slane %v1141_v43, %v2992_v36 }
 0x364   : > { %v1130_v47 = vrot.slane %v1109_v41, 4  ;;  %v1054_v48 = vrot.slane %v853_v45, 4  ;;  %v1049_v49 = vsel %vm686_vm6, %v1048_v6, %v850_v25  ;;  %v1115_v50 = vperm.slane %v1111_v44, %v2982_v16 }
 0x365   : > { %v1053_v52 = vperm.slane %v1049_v49, %v2982_v16  ;;  %v2330_v53 = vpop.permute.xlu0 %2329  ;;  %v1156_v1 = vrot.slane %v1151_v46, 4  ;;  %v1152_v7 = vrot.slane %v1147_v54, 4 }
 0x366   : > { %v1055_v55 = vsel %vm686_vm6, %v1054_v48, %v851_v51  ;;  %v2332_v56 = vunpack.i.h.bf16 %v2330_v53  ;;  %v2331_v42 = vunpack.i.l.bf16 %v2330_v53  ;;  %v1131_v57 = vsel %vm686_vm6, %v1115_v50, %v1130_v47 }
 0x367   : > { %v1059_v58 = vperm.slane %v1055_v55, %v2982_v16  ;;  %v1074_v59 = vrot.slane %v1053_v52, 4  ;;  %v1139_v60 = vperm.slane %v1131_v57, %v2992_v36  ;;  %v1128_v61 = vrot.slane %v1115_v50, 4 }
 0x368   : > { %v857_v63 = vsel %vm849_vm7, %v741_v5, %v2332_v56  ;;  %v854_v0 = vsel %vm849_vm7, %v3074_v40, %v2331_v42  ;;  %v2658_v57 = vmov -1e+30  }
 0x369   : > { %v1072_v2 = vrot.slane %v1059_v58, 4  ;;  %v1066_v3 = vrot.slane %v857_v63, 4  ;;  %v1061_v4 = vsel %vm686_vm6, %v1060_v23, %v854_v0  ;;  %v1157_v9 = vsel %vm686_vm6, %v1156_v1, %v1139_v60 }
 0x36a   : > { %v1065_v8 = vperm.slane %v1061_v4, %v2982_v16  ;;  %v1129_v10 = vsel %vm686_vm6, %v1128_v61, %v1109_v41  ;;  %v1158_v11 = vrot.slane %v1139_v60, 4  ;;  %v1295_v14 = vpack.c.bf16 %v1157_v9, %v1157_v9 }
 0x36b   : > { %v1067_v12 = vsel %vm686_vm6, %v1066_v3, %v855_v62  ;;  %v1135_v5 = vperm.slane %v1129_v10, %v2992_v36  ;;  %v1075_v40 = vsel %vm686_vm6, %v1059_v58, %v1074_v59  ;;  %v1073_v34 = vsel %vm686_vm6, %v1072_v2, %v1053_v52 }
 0x36c   : > { %v1071_v15 = vperm.slane %v1067_v12, %v2982_v16  ;;  %v1086_v17 = vrot.slane %v1065_v8, 4  ;;  %v1159_v18 = vsel %vm686_vm6, %v1151_v46, %v1158_v11  ;;  %v1083_v19 = vperm.slane %v1075_v40, %v2992_v36 }
 0x36d   : > { %v1340_v20 = vsel %vm1297_vm8, %v1295_v14, 0  ;;  %v1153_v21 = vsel %vm686_vm6, %v1152_v7, %v1135_v5  ;;  %v1296_v22 = vpack.c.bf16 %v1159_v18, %v1159_v18  ;;  %v1154_v6 = vrot.slane %v1135_v5, 4  ;;  %v1162_v5 = vpop.permute.xlu0 %1161 }
 0x36e   : > { %v1084_v23 = vrot.slane %v1071_v15, 4  ;;  %1349 = vmatpush.bf16.xpose.msra.mxu3 %v1340_v20  ;;  %v1293_v24 = vpack.c.bf16 %v1153_v21, %v1153_v21  ;;  %v1087_v26 = vsel %vm686_vm6, %v1071_v15, %v1086_v17  ;;  %v1102_v31 = vrot.slane %v1083_v19, 4  ;;  %v1164_v15 = vpop.permute.xlu1 %1163  ;;  %v1166_v17 = vpop.permute.xlu2 %1165 }
 0x36f   : > { %v1359_v27 = vsel %vm1297_vm8, %v1296_v22, 0  ;;  %v1155_v28 = vsel %vm686_vm6, %v1147_v54, %v1154_v6  ;;  %v1095_v29 = vperm.slane %v1087_v26, %v2992_v36  ;;  %v1079_v38 = vperm.slane %v1073_v34, %v2992_v36 }
 0x370   : > { %v1302_v32 = vsel %vm1297_vm8, %v1293_v24, 0  ;;  %1368 = vmatpush.bf16.xpose.msrb.mxu0 %v1359_v27  ;;  %v1294_v33 = vpack.c.bf16 %v1155_v28, %v1155_v28  ;;  %v1085_v35 = vsel %vm686_vm6, %v1084_v23, %v1065_v8  ;;  %v558_v52 = vlaneseq }
 0x371   : > { %1311 = vmatpush.bf16.xpose.msra.mxu1 %v1302_v32  ;;  %v1100_v37 = vrot.slane %v1095_v29, 4  ;;  %v1091_v39 = vperm.slane %v1085_v35, %v2992_v36  ;;  %v1103_v43 = vsel %vm686_vm6, %v1095_v29, %v1102_v31  ;;  %v1098_v25 = vrot.slane %v1079_v38, 4 }
 0x372   : > { %v1321_v41 = vsel %vm1297_vm8, %v1294_v33, 0  ;;  %v1292_v47 = vpack.c.bf16 %v1103_v43, %v1103_v43  ;;  %v559_v53 = vshrl.u32 %v558_v52, 7  ;;  %v561_v54 = vand.u32 127, %v558_v52 }
 0x373   : > { %1330 = vmatpush.bf16.xpose.msra.mxu2 %v1321_v41  ;;  %v1101_v44 = vsel %vm686_vm6, %v1100_v37, %v1083_v19  ;;  %v1096_v45 = vrot.slane %v1091_v39, 4  ;;  %v1099_v49 = vsel %vm686_vm6, %v1091_v39, %v1098_v25  ;;  %v2348_v40 = vpack.i.bf16 %v1162_v5, %v2946_v30 }
 0x374   : > { %v1291_v46 = vpack.c.bf16 %v1101_v44, %v1101_v44  ;;  %v1290_v51 = vpack.c.bf16 %v1099_v49, %v1099_v49  ;;  %vm562_vm9 = vcmp.le.s32.totalorder %v561_v54, %v559_v53  ;;  %v2353_v18 = vpack.i.bf16 %v1166_v17, %v1164_v15 }
 0x375   : > { %v1097_v48 = vsel %vm686_vm6, %v1096_v45, %v1079_v38  ;;  %v563_v58 = vsel %vm562_vm9, 0.0, %v2658_v57 }
 0x376   : > { %2056 = vmatmul.msk.bf16.vlgmr.msra.gmra.mxu3 %vm1297_vm8, %v1291_v46  ;;  %v1289_v50 = vpack.c.bf16 %v1097_v48, %v1097_v48 }
 0x377   : > { %2057 = vmatmul.msk.bf16.vlgmr.msrb.gmra.mxu0 %vm1297_vm8, %v1292_v47 }
 0x378   : > { %2054 = vmatmul.msk.bf16.vlgmr.msra.gmra.mxu1 %vm1297_vm8, %v1289_v50 }
 0x37a   : > { %2055 = vmatmul.msk.bf16.vlgmr.msra.gmra.mxu2 %vm1297_vm8, %v1290_v51 }
 0x3f4   : > { %v1370_v55 = vpop.f32.mrf.mxu0 }
 0x3f5   : > { %v1313_v56 = vpop.f32.mrf.mxu1  ;;  %v1377_v3 = vmul.f32 0.35355338, %v1370_v55 }
 0x3f6   : > { %v1374_v42 = vmul.f32 0.35355338, %v1313_v56 }
 0x3f7   : > { %v1381_v11 = vadd.f32 %v1377_v3, %v563_v58 }
 0x3f8   : > { %v1378_v59 = vadd.f32 %v1374_v42, %v563_v58 }
 0x3f9   : > { %v1351_v60 = vpop.f32.mrf.mxu3  ;;  %v1391_v14 = vsel %vm1297_vm8, %v1381_v11, -inf }
 0x3fa   : > { %v1376_v61 = vmul.f32 0.35355338, %v1351_v60  ;;  %v1382_v62 = vsel %vm1297_vm8, %v1378_v59, -inf }
 0x3fb   : > { %1383 = vmax.xlane.f32.xlu2 %v1382_v62 }
 0x3fc   : > { %v1372_v63 = vpop.f32.mrf.mxu0  ;;  %v1380_v0 = vadd.f32 %v1376_v61, %v563_v58 }
 0x3fd   : > { %v1332_v1 = vpop.f32.mrf.mxu2  ;;  %v1315_v2 = vpop.f32.mrf.mxu1 }
 0x3fe   : > { %v1375_v4 = vmul.f32 0.35355338, %v1332_v1  ;;  %v1388_v7 = vsel %vm1297_vm8, %v1380_v0, -inf }
 0x3ff   : > { %1389 = vmax.xlane.f32.xlu0 %v1388_v7 }
 0x400   : > { %v1379_v8 = vadd.f32 %v1375_v4, %v563_v58 }
 0x401   : > { %v1353_v9 = vpop.f32.mrf.mxu3 }
 0x402   : > { %v1385_v10 = vsel %vm1297_vm8, %v1379_v8, -inf }
 0x403   : > { %1386 = vmax.xlane.f32.xlu1 %v1385_v10 }
 0x405   : > { %v1334_v12 = vpop.f32.mrf.mxu2 }
 0x407   : > { %1392 = vmax.xlane.f32.xlu0 %v1391_v14 }
 0x413   : > { %2349 = vrot.lane.b32.xlu2 %v2348_v40, %s2659_s11 }
 0x41c   : > { %2354 = vrot.lane.b32.xlu1 %v2353_v18, %s2659_s11 }
 0x46e   : > { %v1384_v24 = vpop.xlane.xlu2 %1383 }
 0x46f   : > { %v1394_v30 = vsub.f32 %v1378_v59, %v1384_v24 }
 0x471   : > { %v1398_v32 = vmul.f32 1.442695, %v1394_v30 }
 0x472   : > { %v1390_v19 = vpop.xlane.xlu0 %1389 }
 0x473   : > { %v1396_v20 = vsub.f32 %v1380_v0, %v1390_v19 }
 0x475   : > { %v1402_v21 = vmul.f32 1.442695, %v1396_v20 }
 0x476   : > { %v1387_v22 = vpop.xlane.xlu1 %1386  ;;  %v2350_v38 = vpop.permute.xlu2 %2349 }
 0x477   : > { %2364 = vpow2.f32 %v1402_v21  ;;  %v1395_v6 = vsub.f32 %v1379_v8, %v1387_v22  ;;  %v2352_v41 = vunpack.i.h.bf16 %v2350_v38  ;;  %v2351_v43 = vunpack.i.l.bf16 %v2350_v38 }
 0x479   : > { %v1400_v23 = vmul.f32 1.442695, %v1395_v6  ;;  %v1193_v25 = vrot.slane %v2352_v41, 4  ;;  %v1181_v46 = vrot.slane %v2351_v43, 4 }
 0x47a   : > { %v1393_v26 = vpop.xlane.xlu0 %1392 }
 0x47b   : > { %v1397_v27 = vsub.f32 %v1381_v11, %v1393_v26  ;;  %2366 = vpow2.f32 %v1400_v23 }
 0x47d   : > { %v3160_v28 = vpop.eup %2364  ;;  %v1404_v29 = vmul.f32 1.442695, %v1397_v27 }
 0x47e   : > { %v1412_v31 = vsel %vm1297_vm8, %v3160_v28, 0.0 }
 0x47f   : > { %2368 = vpow2.f32 %v1404_v29  ;;  %1413 = vadd.xlane.f32.xlu0 %v1412_v31 }
 0x480   : > { %2370 = vpow2.f32 %v1398_v32 }
 0x481   : > { %v3164_v33 = vpop.eup %2366 }
 0x482   : > { %v1409_v35 = vsel %vm1297_vm8, %v3164_v33, 0.0 }
 0x485   : > { %v3166_v34 = vpop.eup %2368 }
 0x486   : > { %v1415_v37 = vsel %vm1297_vm8, %v3166_v34, 0.0  ;;  %v3172_v39 = vpop.eup %2370 }
 0x487   : > { %1410 = vadd.xlane.f32.xlu0 %v1409_v35  ;;  %1416 = vadd.xlane.f32.xlu2 %v1415_v37  ;;  %v1406_v45 = vsel %vm1297_vm8, %v3172_v39, 0.0 }
 0x48e   : > { %v2355_v44 = vpop.permute.xlu1 %2354 }
 0x48f   : > { %v2357_v47 = vunpack.i.h.bf16 %v2355_v44  ;;  %v2356_v48 = vunpack.i.l.bf16 %v2355_v44  ;;  %1407 = vadd.xlane.f32.xlu0 %v1406_v45 }
 0x491   : > { %v1191_v49 = vrot.slane %v2357_v47, 4  ;;  %v1179_v50 = vrot.slane %v2356_v48, 4  ;;  %v1182_v51 = vsel %vm686_vm6, %v2356_v48, %v1181_v46  ;;  %v1194_v52 = vsel %vm686_vm6, %v2357_v47, %v1193_v25 }
 0x492   : > { %v1190_v53 = vperm.slane %v1182_v51, %v2982_v16  ;;  %v1202_v54 = vperm.slane %v1194_v52, %v2982_v16 }
 0x493   : > { %v1180_v55 = vsel %vm686_vm6, %v1179_v50, %v2351_v43  ;;  %v1192_v56 = vsel %vm686_vm6, %v1191_v49, %v2352_v41 }
 0x494   : > { %v1186_v42 = vperm.slane %v1180_v55, %v2982_v16  ;;  %v1198_v57 = vperm.slane %v1192_v56, %v2982_v16  ;;  %v1215_v58 = vrot.slane %v1202_v54, 4  ;;  %v1217_v59 = vrot.slane %v1190_v53, 4 }
 0x496   : > { %v1203_v60 = vrot.slane %v1198_v57, 4  ;;  %v1205_v61 = vrot.slane %v1186_v42, 4  ;;  %v1216_v62 = vsel %vm686_vm6, %v1215_v58, %v1190_v53  ;;  %v1218_v63 = vsel %vm686_vm6, %v1202_v54, %v1217_v59 }
 0x497   : > { %v1222_v0 = vperm.slane %v1216_v62, %v2992_v36  ;;  %v1226_v1 = vperm.slane %v1218_v63, %v2992_v36 }
 0x498   : > { %v1204_v2 = vsel %vm686_vm6, %v1203_v60, %v1186_v42  ;;  %v1206_v3 = vsel %vm686_vm6, %v1198_v57, %v1205_v61 }
 0x499   : > { %v1210_v4 = vperm.slane %v1204_v2, %v2992_v36  ;;  %v1214_v7 = vperm.slane %v1206_v3, %v2992_v36  ;;  %v1231_v8 = vrot.slane %v1222_v0, 4  ;;  %v1233_v9 = vrot.slane %v1226_v1, 4 }
 0x49b   : > { %v1227_v10 = vrot.slane %v1210_v4, 4  ;;  %v1229_v11 = vrot.slane %v1214_v7, 4  ;;  %v1234_v12 = vsel %vm686_vm6, 0.0, %v1233_v9  ;;  %v1246_v14 = vsel %vm686_vm6, %v1233_v9, %v1222_v0 }
 0x49c   : > { %v1251_v5 = vrot.slane %v1234_v12, 4  ;;  %v1232_v15 = vsel %vm686_vm6, 0.0, %v1231_v8  ;;  %v1250_v18 = vperm.slane %v1246_v14, %v2982_v16 }
 0x49d   : > { %v1230_v40 = vsel %vm686_vm6, 0.0, %v1229_v11  ;;  %v1235_v17 = vsel %vm686_vm6, %v1229_v11, %v1210_v4  ;;  %v1228_v22 = vsel %vm686_vm6, 0.0, %v1227_v10 }
 0x49e   : > { %v1240_v19 = vrot.slane %v1230_v40, 4  ;;  %v1239_v20 = vperm.slane %v1235_v17, %v2982_v16  ;;  %v1252_v21 = vsel %vm686_vm6, %v1251_v5, %v1232_v15  ;;  %v1271_v23 = vrot.slane %v1250_v18, 4 }
 0x49f   : > { %v1256_v6 = vperm.slane %v1252_v21, %v2982_v16 }
 0x4a0   : > { %v1241_v24 = vsel %vm686_vm6, %v1240_v19, %v1228_v22  ;;  %v1259_v26 = vrot.slane %v1239_v20, 4 }
 0x4a1   : > { %v1245_v27 = vperm.slane %v1241_v24, %v2982_v16  ;;  %v1272_v30 = vsel %vm686_vm6, %v1256_v6, %v1271_v23  ;;  %v1269_v29 = vrot.slane %v1256_v6, 4  ;;  %v2110_v6 = vld [vmem:[%s2920_s7 + $0x8] sm:$0xff] }
 0x4a2   : > { %v1280_v31 = vperm.slane %v1272_v30, %v2992_v36 }
 0x4a3   : > { %v1260_v32 = vsel %vm686_vm6, %v1245_v27, %v1259_v26  ;;  %v1257_v35 = vrot.slane %v1245_v27, 4  ;;  %v1270_v37 = vsel %vm686_vm6, %v1269_v29, %v1250_v18 }
 0x4a4   : > { %v1268_v38 = vperm.slane %v1260_v32, %v2992_v36  ;;  %v1285_v41 = vrot.slane %v1280_v31, 4  ;;  %v1276_v43 = vperm.slane %v1270_v37, %v2992_v36 }
 0x4a5   : > { %v1258_v44 = vsel %vm686_vm6, %v1257_v35, %v1239_v20 }
 0x4a6   : > { %v1286_v45 = vsel %vm686_vm6, %v1285_v41, %v1268_v38  ;;  %v1287_v25 = vrot.slane %v1268_v38, 4  ;;  %v1264_v46 = vperm.slane %v1258_v44, %v2992_v36  ;;  %v1281_v47 = vrot.slane %v1276_v43, 4 }
 0x4a7   : > { %v1432_v48 = vpack.c.bf16 %v1286_v45, %v1286_v45 }
 0x4a8   : > { %v1282_v49 = vsel %vm686_vm6, %v1281_v47, %v1264_v46  ;;  %v1288_v50 = vsel %vm686_vm6, %v1280_v31, %v1287_v25  ;;  %v1283_v51 = vrot.slane %v1264_v46, 4 }
 0x4a9   : > { %v1477_v52 = vsel %vm1437_vm10, %v1432_v48, 0  ;;  %v1430_v53 = vpack.c.bf16 %v1282_v49, %v1282_v49  ;;  %v1433_v54 = vpack.c.bf16 %v1288_v50, %v1288_v50 }
 0x4aa   : > { %1486 = vmatpush.bf16.msrb.mxu3 %v1477_v52  ;;  %v1284_v55 = vsel %vm686_vm6, %v1276_v43, %v1283_v51 }
 0x4ab   : > { %v1439_v56 = vsel %vm1437_vm10, %v1430_v53, 0  ;;  %v1496_v42 = vsel %vm1437_vm10, %v1433_v54, 0  ;;  %v1431_v57 = vpack.c.bf16 %v1284_v55, %v1284_v55 }
 0x4ac   : > { %1448 = vmatpush.bf16.msrb.mxu1 %v1439_v56  ;;  %1505 = vmatpush.bf16.msra.mxu0 %v1496_v42 }
 0x4ad   : > { %v1458_v58 = vsel %vm1437_vm10, %v1431_v57, 0 }
 0x4ae   : > { %1467 = vmatpush.bf16.msrb.mxu2 %v1458_v58 }
 0x4b0   : > { %1664 = vmatpush.bf16.msra.mxu1 %v2110_v6 }
 0x4f2   : > { %v1414_v59 = vpop.xlane.xlu0 %1413 }
 0x4f3   : > { %2372 = vrcp.f32 %v1414_v59 }
 0x4f9   : > { %v2373_v60 = vpop.eup %2372 }
 0x4fa   : > { %v1424_v61 = vmul.f32 %v2373_v60, %v3160_v28  ;;  %v1411_v62 = vpop.xlane.xlu0 %1410  ;;  %v1417_v63 = vpop.xlane.xlu2 %1416 }
 0x4fb   : > { %2374 = vrcp.f32 %v1411_v62 }
 0x4fc   : > { %2376 = vrcp.f32 %v1417_v63  ;;  %v1428_v0 = vpack.c.bf16 %v1424_v61, %v1424_v61 }
 0x4fe   : > { %2060 = vmatmul.msk.bf16.vlgmr.msrb.gmra.mxu3 %vm1297_vm8, %v1428_v0 }
 0x501   : > { %v2375_v1 = vpop.eup %2374 }
 0x502   : > { %v2377_v2 = vpop.eup %2376  ;;  %v1423_v3 = vmul.f32 %v2375_v1, %v3164_v33  ;;  %v1408_v4 = vpop.xlane.xlu0 %1407 }
 0x503   : > { %v1425_v7 = vmul.f32 %v2377_v2, %v3166_v34  ;;  %2378 = vrcp.f32 %v1408_v4 }
 0x504   : > { %v1427_v8 = vpack.c.bf16 %v1423_v3, %v1423_v3 }
 0x505   : > { %v1429_v9 = vpack.c.bf16 %v1425_v7, %v1425_v7 }
 0x506   : > { %2059 = vmatmul.msk.bf16.vlgmr.msrb.gmra.mxu2 %vm1297_vm8, %v1427_v8 }
 0x507   : > { %2061 = vmatmul.msk.bf16.vlgmr.msra.gmra.mxu0 %vm1297_vm8, %v1429_v9 }
 0x509   : > { %v2379_v28 = vpop.eup %2378 }
 0x50a   : > { %v1422_v10 = vmul.f32 %v2379_v28, %v3172_v39 }
 0x50c   : > { %v1426_v11 = vpack.c.bf16 %v1422_v10, %v1422_v10 }
 0x50e   : > { %2058 = vmatmul.msk.bf16.vlgmr.msrb.gmra.mxu1 %vm1297_vm8, %v1426_v11 }
 0x581   : > { %v1488_v12 = vpop.f32.mrf.mxu3 }
 0x582   : > { %v1511_v34 = vrot.slane %v1488_v12, 4 }
 0x584   : > { %v1507_v14 = vpop.f32.mrf.mxu0 }
 0x585   : > { %v1523_v33 = vrot.slane %v1507_v14, 4 }
 0x589   : > { %v1469_v5 = vpop.f32.mrf.mxu2  ;;  %v1490_v40 = vpop.f32.mrf.mxu3 }
 0x58a   : > { %v1524_v15 = vsel %vm686_vm6, %v1523_v33, %v1469_v5  ;;  %v1525_v17 = vrot.slane %v1469_v5, 4 }
 0x58b   : > { %v1530_v18 = vperm.slane %v1524_v15, %v2982_v16  ;;  %v1450_v19 = vpop.f32.mrf.mxu1 }
 0x58c   : > { %v1526_v20 = vsel %vm686_vm6, %v1507_v14, %v1525_v17  ;;  %v1512_v39 = vsel %vm686_vm6, %v1511_v34, %v1450_v19  ;;  %v1513_v21 = vrot.slane %v1450_v19, 4  ;;  %v1509_v22 = vpop.f32.mrf.mxu0  ;;  %v2109_v19 = vld [vmem:[%s2920_s7] sm:$0xff] }
 0x58d   : > { %v1534_v23 = vperm.slane %v1526_v20, %v2982_v16  ;;  %v1535_v24 = vrot.slane %v1530_v18, 4  ;;  %v1518_v26 = vperm.slane %v1512_v39, %v2982_v16  ;;  %1665 = vmatpush.bf16.msra.mxu1 %v2109_v19 }
 0x58e   : > { %v1514_v27 = vsel %vm686_vm6, %v1488_v12, %v1513_v21 }
 0x58f   : > { %v1547_v30 = vrot.slane %v1534_v23, 4  ;;  %v1522_v29 = vperm.slane %v1514_v27, %v2982_v16  ;;  %v1536_v31 = vsel %vm686_vm6, %v1535_v24, %v1518_v26  ;;  %v1537_v32 = vrot.slane %v1518_v26, 4  ;;  %v2386_v26 = vld [vmem:[#allocation2] sm:$0xff] }
 0x590   : > { %v1542_v35 = vperm.slane %v1536_v31, %v2992_v36 }
 0x591   : > { %v1538_v37 = vsel %vm686_vm6, %v1530_v18, %v1537_v32  ;;  %v1548_v38 = vsel %vm686_vm6, %v1547_v30, %v1522_v29  ;;  %v1549_v41 = vrot.slane %v1522_v29, 4  ;;  %v1471_v43 = vpop.f32.mrf.mxu2  ;;  %v2112_v32 = vld [vmem:[%s2925_s22 + $0x8] sm:$0xff] }
 0x592   : > { %v1546_v44 = vperm.slane %v1538_v37, %v2992_v36  ;;  %v1554_v45 = vperm.slane %v1548_v38, %v2992_v36  ;;  %v1559_v48 = vrot.slane %v1542_v35, 4  ;;  %1720 = vmatpush.bf16.msra.mxu2 %v2112_v32 }
 0x593   : > { %v1550_v25 = vsel %vm686_vm6, %v1534_v23, %v1549_v41  ;;  %v1452_v46 = vpop.f32.mrf.mxu1 }
 0x594   : > { %v1558_v47 = vperm.slane %v1550_v25, %v2992_v36  ;;  %v1561_v49 = vrot.slane %v1546_v44, 4  ;;  %v1563_v51 = vrot.slane %v1554_v45, 4  ;;  %v1560_v56 = vsel %vm686_vm6, 0.0, %v1559_v48  ;;  %v2359_v48 = vld [vmem:[%s536_s13] ss:$0 sm:$0xff] }
 0x596   : > { %v1562_v50 = vsel %vm686_vm6, 0.0, %v1561_v49  ;;  %v1565_v52 = vrot.slane %v1558_v47, 4  ;;  %v1567_v53 = vsel %vm686_vm6, %v1561_v49, %v1542_v35  ;;  %v1564_v61 = vsel %vm686_vm6, 0.0, %v1563_v51  ;;  %v2111_v35 = vld [vmem:[%s2925_s22] sm:$0xff] }
 0x597   : > { %v1572_v54 = vrot.slane %v1562_v50, 4  ;;  %v1571_v55 = vperm.slane %v1567_v53, %v2982_v16  ;;  %1721 = vmatpush.bf16.msra.mxu2 %v2111_v35  ;;  %v2116_v53 = vld [vmem:[%s2931_s28 + $0x18] sm:$0xff] }
 0x598   : > { %v1566_v42 = vsel %vm686_vm6, 0.0, %v1565_v52  ;;  %v1578_v57 = vsel %vm686_vm6, %v1565_v52, %v1554_v45  ;;  %1793 = vmatpush.bf16.msra.mxu3 %v2116_v53 }
 0x599   : > { %v1583_v58 = vrot.slane %v1566_v42, 4  ;;  %v1573_v59 = vsel %vm686_vm6, %v1572_v54, %v1560_v56  ;;  %v1582_v60 = vperm.slane %v1578_v57, %v2982_v16  ;;  %v1591_v63 = vrot.slane %v1571_v55, 4  ;;  %v2115_v54 = vld [vmem:[%s2931_s28 + $0x10] sm:$0xff] }
 0x59a   : > { %v1577_v62 = vperm.slane %v1573_v59, %v2982_v16 }
 0x59b   : > { %v1584_v0 = vsel %vm686_vm6, %v1583_v58, %v1564_v61  ;;  %v1603_v1 = vrot.slane %v1582_v60, 4 }
 0x59c   : > { %v1588_v2 = vperm.slane %v1584_v0, %v2982_v16  ;;  %v1589_v3 = vrot.slane %v1577_v62, 4  ;;  %v1592_v4 = vsel %vm686_vm6, %v1577_v62, %v1591_v63  ;;  %1794 = vmatpush.bf16.msra.mxu3 %v2115_v54 }
 0x59d   : > { %v1600_v12 = vperm.slane %v1592_v4, %v2992_v36 }
 0x59e   : > { %v1604_v7 = vsel %vm686_vm6, %v1588_v2, %v1603_v1  ;;  %v1590_v8 = vsel %vm686_vm6, %v1589_v3, %v1571_v55  ;;  %v1601_v9 = vrot.slane %v1588_v2, 4  ;;  %v2114_v55 = vld [vmem:[%s2931_s28 + $0x8] sm:$0xff] }
 0x59f   : > { %v1612_v28 = vperm.slane %v1604_v7, %v2992_v36  ;;  %v1596_v10 = vperm.slane %v1590_v8, %v2992_v36  ;;  %v1619_v17 = vrot.slane %v1600_v12, 4 }
 0x5a0   : > { %v1602_v11 = vsel %vm686_vm6, %v1601_v9, %v1582_v60  ;;  %1795 = vmatpush.bf16.msra.mxu3 %v2114_v55  ;;  %v2113_v60 = vld [vmem:[%s2931_s28] sm:$0xff] }
 0x5a1   : > { %v1617_v14 = vrot.slane %v1612_v28, 4  ;;  %v1608_v16 = vperm.slane %v1602_v11, %v2992_v36  ;;  %v1615_v33 = vrot.slane %v1596_v10, 4  ;;  %v1620_v18 = vsel %vm686_vm6, %v1612_v28, %v1619_v17 }
 0x5a3   : > { %v1618_v5 = vsel %vm686_vm6, %v1617_v14, %v1600_v12  ;;  %v1613_v40 = vrot.slane %v1608_v16, 4  ;;  %v1616_v34 = vsel %vm686_vm6, %v1608_v16, %v1615_v33 }
 0x5a4   : > { %1626 = vrot.lane.b32.xlu0 %v1618_v5, %s2647_s18  ;;  %1622 = vrot.lane.b32.xlu1 %v1616_v34, %s2660_s20 }
 0x5a5   : > { %v1614_v15 = vsel %vm686_vm6, %v1613_v40, %v1596_v10  ;;  %1796 = vmatpush.bf16.msra.mxu3 %v2113_v60 }
 0x5ac   : > { %1630 = vrot.lane.b32.xlu1 %v1620_v18, %s2661_s29 }
 0x616   : > { %v1623_v36 = vpop.permute.xlu1 %1622  ;;  %v1627_v20 = vpop.permute.xlu0 %1626 }
 0x617   : > { %v1633_v39 = vsel %vm1297_vm8, %v1614_v15, %v1623_v36 }
 0x618   : > { %v1635_v22 = vsel %vm1634_vm11, %v1633_v39, %v1627_v20 }
 0x61e   : > { %v1631_v21 = vpop.permute.xlu1 %1630 }
 0x61f   : > { %v1637_v6 = vsel %vm1636_vm12, %v1635_v22, %v1631_v21 }
 0x620   : > { %v1638_v23 = vpack.c.bf16 %v1637_v6, %v1637_v6 }
 0x622   : > { %2070 = vmatmul.msk.bf16.vlgmr.msra.gmra.mxu1 %vm566_vm1, %v1638_v23 }
 0x69f   : > { %v1667_v24 = vpop.f32.mrf.mxu1 }
 0x6a0   : > { %v3273_v27 = vadd.f32 %v2386_v26, %v1667_v24 }
 0x6a2   : > { %v1673_v30 = vmul.f32 %v3273_v27, %v3273_v27 }
 0x6a4   : > { %v1674_v29 = vsel %vm566_vm1, %v1673_v30, 0.0 }
 0x6a5   : > { %1675 = vadd.xlane.f32.xlu1 %v1674_v29 }
 0x6a7   : > { %v1669_v31 = vpop.f32.mrf.mxu1 }
 0x718   : > { %v1676_v37 = vpop.xlane.xlu1 %1675 }
 0x719   : > { %v1677_v38 = vmul.f32 %v1676_v37, %v2937_v13 }
 0x71b   : > { %v1678_v41 = vadd.f32 1e-05, %v1677_v38 }
 0x71d   : > { %2380 = vrsqrt.f32 %v1678_v41  ;;  %vm1685_vm14 = vweird.f32 %v1678_v41 }
 0x723   : > { %v2381_v43 = vpop.eup %2380 }
 0x724   : > { %v1680_v44 = vmul.f32 %v2381_v43, %v1678_v41  ;;  %vm1686_vm13 = vweird.f32 %v2381_v43 }
 0x725   : > { %vm1687_vm15 = vmor %vm1685_vm14, %vm1686_vm13 }
 0x726   : > { %v1681_v45 = vmul.f32 %v2381_v43, %v1680_v44 }
 0x728   : > { %v1682_v25 = vmul.f32 0.5, %v1681_v45 }
 0x72a   : > { %v1683_v46 = vsub.f32 1.5, %v1682_v25 }
 0x72c   : > { %v1684_v47 = vmul.f32 %v2381_v43, %v1683_v46 }
 0x72e   : > { %v1688_v49 = vsel %vm1687_vm15, %v2381_v43, %v1684_v47 }
 0x72f   : > { %v1689_v50 = vmul.f32 %v1688_v49, %v3273_v27 }
 0x731   : > { %v1693_v51 = vmul.f32 %v2359_v48, %v1689_v50 }
 0x733   : > { %v1694_v52 = vpack.c.bf16 %v1693_v51, %v1693_v51 }
 0x735   : > { %2079 = vmatmul.msk.bf16.vlgmr.msra.gmra.mxu2 %vm566_vm1, %v1694_v52 }
 0x7b8   : > { %v1723_v56 = vpop.f32.mrf.mxu2 }
 0x7b9   : > { %1748 = vrot.lane.b32.xlu0 %v1723_v56, %s2659_s11  ;;  %v2080_v57 = vmul.f32 -1.442695, %v1723_v56 }
 0x7bb   : > { %2382 = vpow2.f32 %v2080_v57 }
 0x7c0   : > { %v1725_v42 = vpop.f32.mrf.mxu2 }
 0x7c1   : > { %v2383_v58 = vpop.eup %2382 }
 0x7c2   : > { %v1730_v59 = vadd.f32 1.0, %v2383_v58 }
 0x7c4   : > { %2384 = vrcp.f32 %v1730_v59  ;;  %v1742_v2 = vand.u32 2147483648, %v1730_v59  ;;  %vm1736_vm2 = vweird.f32 %v1730_v59  ;;  %v1740_v3 = vand.u32 2147483647, %v1730_v59 }
 0x7c6   : > { %v1743_v7 = vor.u32 1.1754944e-38, %v1742_v2  ;;  %vm1741_vm4 = vcmp.eq.f32.partialorder %v1740_v3, 8.507059e+37 }
 0x7ca   : > { %v2385_v61 = vpop.eup %2384 }
 0x7cb   : > { %v1732_v62 = vmul.f32 %v2385_v61, %v1730_v59  ;;  %vm1737_vm0 = vweird.f32 %v2385_v61 }
 0x7cc   : > { %vm1738_vm3 = vmor %vm1736_vm2, %vm1737_vm0 }
 0x7cd   : > { %v1733_v63 = vsub.f32 1.0, %v1732_v62 }
 0x7cf   : > { %v1734_v0 = vmul.f32 %v2385_v61, %v1733_v63 }
 0x7d1   : > { %v1735_v1 = vadd.f32 %v2385_v61, %v1734_v0 }
 0x7d3   : > { %v1739_v4 = vsel %vm1738_vm3, %v2385_v61, %v1735_v1 }
 0x7d4   : > { %v1744_v8 = vsel %vm1741_vm4, %v1743_v7, %v1739_v4 }
 0x7d5   : > { %v1746_v9 = vmul.f32 %v1744_v8, %v1723_v56 }
 0x82b   : > { %v1749_v28 = vpop.permute.xlu0 %1748 }
 0x82c   : > { %v1751_v10 = vmul.f32 %v1749_v28, %v1746_v9 }
 0x82e   : > { %v1752_v11 = vpack.c.bf16 %v1751_v10, %v1751_v10 }
 0x830   : > { %2097 = vmatmul.msk.bf16.vlgmr.msra.gmra.mxu3 %vm1785_vm5, %v1752_v11 }
 0x8b3   : > { %v1798_v12 = vpop.f32.mrf.mxu3 }
 0x8b4   : > { %v1802_v14 = vadd.f32 %v1798_v12, %v3273_v27 }
 0x8b6   : > { %1803 = vst.msk [vmem:[#allocation2] sm:$0xff] %vm566_vm1, %v1802_v14 }
 0x8b7   : > { %1807 = sbr.rel (%p2098_p13) target bundleno = 2382 (0x94e), region = 84 }
 0x8bb   : > { %v1800_v16 = vpop.f32.mrf.mxu3 }
 0x8bc   : > { %v1809_v33 = vmul.f32 %v1802_v14, %v1802_v14  ;;  %v2387_v21 = vld [vmem:[%s3414_s10] ss:$0 sm:$0xff] }
 0x8be   : > { %v1810_v5 = vsel %vm566_vm1, %v1809_v33, 0.0 }
 0x8bf   : > { %1811 = vadd.xlane.f32.xlu0 %v1810_v5 }
 0x932   : > { %v1812_v40 = vpop.xlane.xlu0 %1811 }
 0x933   : > { %v1813_v34 = vmul.f32 %v1812_v40, %v2937_v13 }
 0x935   : > { %v1814_v15 = vadd.f32 1e-05, %v1813_v34 }
 0x937   : > { %2388 = vrsqrt.f32 %v1814_v15  ;;  %vm1821_vm7 = vweird.f32 %v1814_v15 }
 0x93d   : > { %v2389_v17 = vpop.eup %2388 }
 0x93e   : > { %v1816_v18 = vmul.f32 %v2389_v17, %v1814_v15  ;;  %vm1822_vm6 = vweird.f32 %v2389_v17 }
 0x93f   : > { %vm1823_vm8 = vmor %vm1821_vm7, %vm1822_vm6 }
 0x940   : > { %v1817_v19 = vmul.f32 %v2389_v17, %v1816_v18 }
 0x942   : > { %v1818_v36 = vmul.f32 0.5, %v1817_v19 }
 0x944   : > { %v1819_v20 = vsub.f32 1.5, %v1818_v36 }
 0x946   : > { %v1820_v39 = vmul.f32 %v2389_v17, %v1819_v20 }
 0x948   : > { %v1824_v22 = vsel %vm1823_vm8, %v2389_v17, %v1820_v39 }
 0x949   : > { %v1825_v6 = vmul.f32 %v1824_v22, %v1802_v14 }
 0x94b   : > { %v1829_v23 = vmul.f32 %v2387_v21, %v1825_v6 }
 0x94d   : > { %1830 = vst.msk [vmem:[%s2933_s24] sm:$0xff] %vm566_vm1, %v1829_v23 }
 0x94e PF: > { %s3415_s13 = sld [smem:[#allocation19_spill]]  ;;  %s1844_s9 = sshll.u32 %s2933_s24, 4  ;;  %s1845_s9 = int_to_ptr.vmem [resolvable:$true] %s1844_s9 }
 0x94f   : > { %s3417_s18 = sld [smem:[#allocation34_spill]]  ;;  %s1832_s26 = scalar_lea.sflag [#allocation5], %s2886_s27 }
 0x954   : > { %s2100_s28 = sshll.u32 %s3415_s13, 3 }
 0x955   : > { %s3418_s1 = smov %s3417_s18  ;;  %s1842_s21 = scalar_lea.hbm %s3417_s18, %s2100_s28 }
 0x956   : > { %s1846_s0 = sshll.u32 %s1842_s21, 4  ;;  %s2530_s20 = scalar_lea.hbm %s3418_s1, 16  ;;  %s1847_s0 = int_to_ptr.hbm [resolvable:$true] %s1846_s0 }
 0x957   : > { %s2524_s30 = sshra.s32 %s1847_s0, 4  ;;  %s2525_s30 = int_to_ptr.hbm [resolvable:$true] %s2524_s30 }
 0x958   : > { %s2526_s25 = scalar_lea.hbm %s2525_s30, 8  ;;  %p2531_p9 = scmp.lt.s32.totalorder %s2525_s30, %s3418_s1 }
 0x959   : > { %p2527_p3 = scmp.ne.s32.totalorder %s2525_s30, %s2526_s25  ;;  %p2532_p10 = scmp.lt.s32.totalorder %s2530_s20, %s2526_s25 }
 0x95b   : > { %p2528_p6 = pnand %p2527_p3, %p2813_p12  ;;  %p2533_p11 = por %p2532_p10, %p2531_p9 }
 0x95d   : > { %p2529_p7 = pneg %p2528_p6 }
 0x95f   : > { %p2534_p2 = pnand %p2533_p11, %p2529_p7 }
 0x961   : > { %2537 = shalt.err (!%p2534_p2)
}
 0x962   : > { %2129 = dma.vmem_to_hbm [thread:$0]  (%p2813_p12), %s1845_s9, 128, %s1847_s0, %s1832_s26  }
 0x963 PF: > { %s3419_s27 = sld [smem:[#allocation16_spill]]  ;;  %p2154_p8 = scmp.ge.s32.totalorder %s2640_s23, 2 }
 0x965   : > { %p2146_p5 = pnand %p2154_p8, %p2823_p0 }
 0x967   : > { %p2147_p4 = pneg %p2146_p5 }
 0x969   : > { %s1858_s7 = sand.u32 1, %s3419_s27  }
 0x96a   : > { %s1859_s19 = scalar_lea.sflag [#allocation5], %s1858_s7 }
 0x96b   : > { %2595 = dma.done.wait (%p2147_p4), %s1859_s19, 128  }
 0x96c   : > { %2597 = vsyncadd (%p2147_p4), %s1859_s19, 4294967168  ;;  %s30_s23 = sadd.s32 1, %s2640_s23   ;;  %s3421_s22 = sld [smem:[#allocation17_spill]] }
 0x96d   : > { %p27_p1 = scmp.ge.s32.totalorder %s30_s23, 6   ;;  %s3422_s17 = sld [smem:[#allocation18_spill]] }
 0x96e   : > { %s3423_s18 = sld [smem:[#allocation26_spill]]  ;;  %s3428_s13 = smov %s2604_s14 }
 0x96f   : > { %s3424_s19 = sld [smem:[#allocation20_spill]]  ;;  %s3429_s14 = smov %s2608_s15 }
 0x970   : > { %s3425_s20 = sld [smem:[#allocation21_spill]]  ;;  %s3430_s15 = smov %s2866_s16 }
 0x971   : > { %s3426_s21 = sld [smem:[#allocation24_spill]] }
 0x972   : > { %s3427_s10 = sld [smem:[#allocation25_spill]]  ;;  %s3431_s16 = smov %s3421_s22 }
 0x974   :  { %29 = sbr.rel (!%p27_p1) target bundleno = 21 (0x15), region = 149 }
 0x978   : > { %s3432_s22 = smov %s3427_s10 }
 0x979   :  { %1865 = vsyncpa [#allocation4], 1 }
 0x97a   :  { %1867 = vsyncpa [#allocation4 + $0x1], 1 }
 0x97b   :  { %1868 = vsyncpa [#allocation7], 1 }
 0x97c   :  { %1869 = vsyncpa [#allocation10], 1 }
 0x97d   :  { %1871 = vsyncpa [#allocation10 + $0x1], 1 }
 0x97e   :  { %1872 = vsyncpa [#allocation5], 1 }
 0x97f   :  { %1874 = vsyncpa [#allocation5 + $0x1], 1 }

</bundles_post_ra>
